<compile_context>
chip_gen: v5e
topology: v5e:2x2
jax: 0.10.0
libtpu: 0.0.40
codegen_flags: <defaults>
</compile_context>

<pallas_src>
import jax
import jax.numpy as jnp
from jax import lax
from jax.experimental import pallas as pl
from jax.experimental.pallas import tpu as pltpu

_PREFERRED_LANES = (512, 256, 128)     # lane-dense last dim -> unmasked vst
_TARGET_BLOCK_BYTES = 4 * 1024 * 1024  # ~4 MiB blocks: good on v5e/v6e/v7x
_VMEM_LIMIT_BYTES = 48 << 20           # explicit: v5e scoped default is only 16 MiB
_SMALL_INPUT_BYTES = 256 * 1024        # below this, fused XLA multiply wins


def _make_brightness_kernel(factor):
    # `factor` is a static module hyper-parameter -> baked as an immediate (no
    # SMEM traffic).  A distinct factor value means a distinct compile; if factor
    # ever needed to be traced, pass it via scalar prefetch / SMEM instead.
    def kernel(x_ref, o_ref):
        o_ref[...] = x_ref[...] * factor  # weak-typed float keeps x's float dtype

    return kernel


def brightness_augmentation_pallas(x, factor, *, donate=False):
    """x * factor.

    Uses a lane-dense, tiled streaming Pallas kernel for large, 128-aligned
    float tensors; otherwise falls back to a fused XLA multiply (already at the
    2-pass HBM roofline, and avoids wrapper pad/slice passes entirely).
    """
    factor = float(factor)
    orig_shape, dtype = x.shape, x.dtype
    n = x.size
    itemsize = jnp.dtype(dtype).itemsize

    if (
        n * itemsize < _SMALL_INPUT_BYTES
        or not jnp.issubdtype(dtype, jnp.floating)
        or n % 128 != 0
    ):
        # TODO(synk): a rank-1 Pallas kernel with a masked partial tail block
        # could also cover large non-128-aligned sizes without extra HBM passes.
        return x * factor

    # Lane-dense 2-D view; reshape of a contiguous array is a free bitcast.
    lane = next(l for l in _PREFERRED_LANES if n % l == 0)
    rows = n // lane

    # Sublane packing granularity: f32 -> 8, bf16/f16 -> 16.
    sub = max(8, 32 // itemsize)

    # Rows per block: multiple of `sub`, capped at ~4 MiB.  With in+out
    # double-buffering (~4x block) this stays far below scoped VMEM on all gens.
    tr = max(sub, (_TARGET_BLOCK_BYTES // (lane * itemsize)) // sub * sub)
    # Keep >= 2 grid steps when possible so the "parallel" axis splits across
    # both TensorCores on v7x and the pipeline actually overlaps DMA/compute.
    if rows > sub:
        tr = min(tr, pl.cdiv(pl.cdiv(rows, 2), sub) * sub)
    tr = max(sub, min(tr, pl.cdiv(rows, sub) * sub))

    x2d = x.reshape(rows, lane)
    out2d = pl.pallas_call(
        _make_brightness_kernel(factor),
        out_shape=jax.ShapeDtypeStruct((rows, lane), dtype),
        grid=(pl.cdiv(rows, tr),),  # last block may be partial; Pallas masks it
        in_specs=[pl.BlockSpec((tr, lane), lambda i: (i, 0))],
        out_specs=pl.BlockSpec((tr, lane), lambda i: (i, 0)),
        input_output_aliases=({0: 0} if donate else {}),
        compiler_params=pltpu.CompilerParams(
            dimension_semantics=("parallel",),
            vmem_limit_bytes=_VMEM_LIMIT_BYTES,
        ),
    )(x2d)
    return out2d.reshape(orig_shape)


def brightness_augmentation(x, y, key, p=0.3, factor=1.0):
    """Mirrors BrightnessAugmentation.forward: with prob p, x_aug = x * factor."""
    # TODO(synk): torch draws the coin with host-side random.random(); here the
    # gate is drawn in-graph with jax.random and lax.cond skips the kernel (and
    # all HBM traffic) entirely when the gate is off.  Float inputs assumed so
    # both cond branches share a dtype.
    apply = jax.random.uniform(key, ()) <= p  # random.random() <= self.prob
    x_aug = lax.cond(
        apply,
        lambda xx: brightness_augmentation_pallas(xx, factor),
        lambda xx: xx,  # gate off: x untouched
        x,
    )
    return x_aug, y  # labels pass through unchanged


if __name__ == "__main__":
    key = jax.random.PRNGKey(0)
    k_x, k_y, k_gate, k_big = jax.random.split(key, 4)

    # Pixel-level augmentation -> small image-like input (B, C, H, W).
    B, C, H, W = 2, 4, 16, 16
    x = jax.random.normal(k_x, (B, C, H, W), dtype=jnp.float32)
    y = jax.random.randint(k_y, (B,), 0, 10, dtype=jnp.int32)

    # Stochastic path with module defaults (p=0.3); small input -> fused fallback.
    x_aug, y_aug = brightness_augmentation(x, y, k_gate, p=0.3, factor=1.5)
    jax.block_until_ready((x_aug, y_aug))

    # p = 1.0 -> gate always fires; labels untouched.
    x_on, y_on = brightness_augmentation(x, y, k_gate, p=1.0, factor=0.25)
    jax.block_until_ready((x_on, y_on))
    assert jnp.allclose(x_on, x * 0.25, rtol=1e-6, atol=1e-6), "gated-on mismatch"
    assert jnp.array_equal(y_on, y), "labels must pass through unchanged"

    # Large image batch -> Pallas streaming kernel (flat size % 512 == 0).
    xb = jax.random.normal(k_big, (8, 3, 224, 224), dtype=jnp.float32)
    xb_scaled = brightness_augmentation_pallas(xb, 1.5)
    jax.block_until_ready(xb_scaled)
    assert jnp.allclose(xb_scaled, xb * 1.5, rtol=1e-6, atol=1e-6), "pallas f32 mismatch"

    # Partial-final-block case (rows not divisible by tr) -> masked last block.
    xp = jax.random.normal(k_big, (1, 3, 200, 512), dtype=jnp.float32)
    xp_scaled = brightness_augmentation_pallas(xp, 3.0)
    jax.block_until_ready(xp_scaled)
    assert jnp.allclose(xp_scaled, xp * 3.0, rtol=1e-6, atol=1e-6), "partial-block mismatch"

    # bf16 input + donated/aliased output buffer variant.
    xh = jax.random.normal(k_big, (4, 3, 256, 256), dtype=jnp.bfloat16)
    xh_scaled = brightness_augmentation_pallas(xh, 2.0, donate=True)
    jax.block_until_ready(xh_scaled)
    assert jnp.allclose(
        xh_scaled.astype(jnp.float32), (xh * 2.0).astype(jnp.float32)
    ), "pallas bf16 mismatch"

    # Awkward tiny non-128-aligned shape stays correct via the fused fallback.
    xa = jax.random.normal(k_x, (3, 5, 17, 9), dtype=jnp.bfloat16)
    xa_scaled = brightness_augmentation_pallas(xa, 2.0)
    jax.block_until_ready(xa_scaled)
    assert jnp.allclose(
        xa_scaled.astype(jnp.float32), (xa * 2.0).astype(jnp.float32)
    ), "fallback mismatch"

    print("KERNEL_OK")
</pallas_src>

<mosaic_0001>
module attributes {stable_mosaic.version = 11 : i64} {
  func.func @kernel(%arg0: i32, %arg1: memref<1176x512xf32, #tpu.memory_space<vmem>>, %arg2: memref<1176x512xf32, #tpu.memory_space<vmem>>) attributes {dimension_semantics = [#tpu.dimension_semantics<parallel>], iteration_bounds = array<i64: 2>, scalar_prefetch = 0 : i64, scratch_operands = 0 : i64, tpu.core_type = #tpu.core_type<tc>, window_params = [{transform_indices = @transform_0, window_bounds = array<i64: 1176, 512>}, {transform_indices = @transform_1, window_bounds = array<i64: 1176, 512>}]} {
    %c0 = arith.constant 0 : index
    %c0_0 = arith.constant 0 : index
    %0 = vector.load %arg1[%c0, %c0_0] : memref<1176x512xf32, #tpu.memory_space<vmem>>, vector<1176x512xf32>
    %cst = arith.constant 1.500000e+00 : f32
    %1 = vector.broadcast %cst : f32 to vector<1176x512xf32>
    %2 = arith.mulf %0, %1 : vector<1176x512xf32>
    %c0_1 = arith.constant 0 : index
    %c0_2 = arith.constant 0 : index
    %3 = vector.load %arg2[%c0_1, %c0_2] : memref<1176x512xf32, #tpu.memory_space<vmem>>, vector<1176x512xf32>
    tpu.vector_store %arg2[%c0_1, %c0_2], %2 {strides = array<i32>} : memref<1176x512xf32, #tpu.memory_space<vmem>>, vector<1176x512xf32>,
    return
  }
  func.func @transform_0(%arg0: i32) -> (i32, i32) {
    %c0_i32 = arith.constant 0 : i32
    %c0_i32_0 = arith.constant 0 : i32
    return %arg0, %c0_i32 : i32, i32
  }
  func.func @transform_1(%arg0: i32) -> (i32, i32) {
    %c0_i32 = arith.constant 0 : i32
    %c0_i32_0 = arith.constant 0 : i32
    return %arg0, %c0_i32 : i32, i32
  }
}

</mosaic_0001>

<bundles_post_ra>
// kernel: tpu_custom_call.1
= control target key start
LH: loop header
LB: loop body
LE: loop exit
PB: predicated region body
PF: predicated region fallthrough
CT: control target
= control target key end

     0   :  { %6 = vsyncpa [#allocation3], 0  ;;  %s3472_s0 = inlined_call_operand.hbm [shape: f32[2352,512], index: 0, kind: input, shape index: {}]   ;;  %s3473_s1 = inlined_call_operand.hbm [shape: f32[2352,512], index: 1, kind: output, shape index: {}]  }
   0x1   :  { %8 = vsyncpa [#allocation3 + $0x1], 0 }
   0x2   :  { %9 = vsyncpa [#allocation4], 0 }
   0x3   :  { %11 = vsyncpa [#allocation4 + $0x1], 0  ;;  %s2174_s6 = smov 0   ;;  %s2176_s7 = smov 0  }
   0x4   :  { %s2178_s8 = smov 0   ;;  %s2180_s9 = smov 0  }
   0x5 LB: > { %s2195_s10 = sadd.s32 4294967295, %s2158_s9   ;;  %s1994_s11 = sadd.s32 4294967294, %s2158_s9   ;;  %s2158_s9 = sphi %s2180_s9, %s3481_s9   ;;  %s2154_s8 = sphi %s2178_s8, %s3480_s8   ;;  %s2150_s7 = sphi %s2176_s7, %s3479_s7   ;;  %s2146_s6 = sphi %s2174_s6, %s3478_s6  }
   0x6   : > { %s2199_s12 = sadd.s32 1, %s2158_s9   ;;  %s24_s13 = sadd.s32 1, %s2154_s8 }
   0x7   : > { %s21_s14 = ssub.s32 %s2158_s9, %s2199_s12  ;;  %p31_p0 = scmp.ne.s32.totalorder %s2154_s8, %s2150_s7 }
   0x8   : > { %p22_p1 = scmp.eq.s32.totalorder %s21_s14, 0  ;;  %p32_p2 = scmp.eq.s32.totalorder %s2158_s9, 0 }
   0x9   : > { %p37_p3 = scmp.ne.s32.totalorder %s2150_s7, %s2146_s6  ;;  %p38_p4 = scmp.eq.s32.totalorder %s2195_s10, 0 }
   0xa   : > { %s2211_s15 = scalar_select %p22_p1, %s2154_s8, %s24_s13  }
   0xb   : > { %p33_p5 = por %p32_p2, %p31_p0  ;;  %p2213_p6 = por %p38_p4, %p37_p3 }
   0xc   : > { %p61_p7 = scmp.eq.s32.totalorder %s2195_s10, 1  ;;  %p67_p8 = scmp.eq.s32.totalorder %s1994_s11, 1 }
   0xd   : > { %p1996_p9 = scmp.ge.s32.totalorder %s2158_s9, 2  ;;  %p2024_p10 = scmp.lt.s32.totalorder %s2158_s9, 2 }
   0xe   : > { %p2220_p11 = por %p61_p7, %p31_p0  ;;  %p2224_p12 = por %p67_p8, %p37_p3 }
   0xf   : > { %s87_s19 = sand.u32 1, %s2154_s8   ;;  %s2008_s20 = smul.u32 4704, %s2158_s9 }
  0x10   : > { %s2010_s21 = smul.u32 4704, %s87_s19  ;;  %p2233_p13 = pnand %p2024_p10, %p33_p5 }
  0x11   : > { %s97_s24 = scalar_lea.hbm %s3472_s0, %s2008_s20  ;;  %s88_s29 = scalar_lea.sflag [#allocation3], %s87_s19 }
  0x12   : > { %s98_s26 = sshll.u32 %s97_s24, 4  ;;  %s91_s27 = scalar_lea.vmem [#allocation2], %s2010_s21  ;;  %s99_s26 = int_to_ptr.hbm [resolvable:$true] %s98_s26 }
  0x13   : > { %s100_s28 = sshll.u32 %s91_s27, 4  ;;  %s2062_s30 = sshra.s32 %s99_s26, 4  ;;  %s101_s28 = int_to_ptr.vmem [resolvable:$true] %s100_s28  ;;  %s2063_s30 = int_to_ptr.hbm [resolvable:$true] %s2062_s30 }
  0x14   : > { %s2064_s2 = scalar_lea.hbm %s2063_s30, 4704  ;;  %p2066_p1 = pneg %p2233_p13 }
  0x15   : > { %p2065_p0 = scmp.ne.s32.totalorder %s2063_s30, %s2064_s2  ;;  %s2069_s5 = scalar_lea.hbm %s3472_s0, 9408 }
  0x16   : > { %p2070_p4 = scmp.lt.s32.totalorder %s2063_s30, %s3472_s0  ;;  %p2071_p5 = scmp.lt.s32.totalorder %s2069_s5, %s2064_s2 }
  0x17   : > { %p2067_p2 = pnand %p2066_p1, %p2065_p0 }
  0x18   : > { %p2072_p7 = por %p2071_p5, %p2070_p4 }
  0x19   : > { %p2068_p3 = pneg %p2067_p2 }
  0x1b   : > { %p2073_p8 = pnand %p2072_p7, %p2068_p3 }
  0x1d   : > { %2076 = shalt.err (!%p2073_p8)
}
  0x1e   : > { %s2160_s14 = smov 512   ;;  %s2161_s19 = smov 32  }
  0x1f   : > { %2019 = dma.hbm_to_vmem [thread:$0]  (!%p2233_p13), %s99_s26, 75264, %s101_s28, %s88_s29, %s2160_s14, %s2160_s14, %s2161_s19  }
  0x20   : > { %p1999_p10 = scmp.ge.s32.totalorder %s2158_s9, 1  ;;  %p108_p0 = scmp.lt.s32.totalorder %s2158_s9, 3 }
  0x22   : > { %p109_p1 = pnand %p1999_p10, %p108_p0 }
  0x23   : > { %s2250_s20 = sand.u32 (!%p109_p1), 1, %s2150_s7  }
  0x24   : > { %112 = sbr.rel (%p109_p1) target bundleno = 636 (0x27c), region = 24  ;;  %s115_s22 = scalar_lea.sflag (!%p109_p1), [#allocation3], %s2250_s20 }
  0x25   : > { %s2011_s21 = smul.u32 (!%p109_p1), 4704, %s2250_s20 }
  0x27   : > { %s2254_s23 = scalar_lea.vmem (!%p109_p1), [#allocation2], %s2011_s21 }
  0x29   : > { %2137 = dma.done.wait (%p2213_p6), %s115_s22, 75264  }
  0x2a   : > { %2139 = vsyncadd (%p2213_p6), %s115_s22, 4294892032  ;;  %v140_v0 = vld [vmem:[%s2254_s23] sm:$0xff]  ;;  %v141_v1 = vld [vmem:[%s2254_s23 + $0x8] sm:$0xff]  ;;  %s2267_s16 = scalar_lea.vmem [#allocation5], %s2011_s21  ;;  %s2009_s24 = smul.u32 4704, %s2195_s10 }
  0x2b   : > { %v142_v2 = vld [vmem:[%s2254_s23 + $0x10] sm:$0xff]  ;;  %v728_v3 = vmul.f32 1.5, %v140_v0  ;;  %v729_v4 = vmul.f32 1.5, %v141_v1  ;;  %v143_v6 = vld [vmem:[%s2254_s23 + $0x18] sm:$0xff]  ;;  %v144_v7 = vld [vmem:[%s2254_s23 + $0x20] sm:$0xff]  ;;  %s1918_s27 = sshll.u32 %s2267_s16, 4  ;;  %s1919_s27 = int_to_ptr.vmem [resolvable:$true] %s1918_s27 }
  0x2c   : > { %v730_v5 = vmul.f32 1.5, %v142_v2  ;;  %v145_v8 = vld [vmem:[%s2254_s23 + $0x28] sm:$0xff]  ;;  %v731_v9 = vmul.f32 1.5, %v143_v6  ;;  %v146_v10 = vld [vmem:[%s2254_s23 + $0x30] sm:$0xff]  ;;  %v732_v11 = vmul.f32 1.5, %v144_v7  ;;  %v147_v12 = vld [vmem:[%s2254_s23 + $0x38] sm:$0xff]  ;;  %s1917_s26 = scalar_lea.hbm %s3473_s1, %s2009_s24 }
  0x2d   : > { %1316 = vst [vmem:[%s2267_s16] sm:$0xff] %v728_v3  ;;  %v733_v13 = vmul.f32 1.5, %v145_v8  ;;  %v148_v14 = vld [vmem:[%s2254_s23 + $0x40] sm:$0xff]  ;;  %v734_v15 = vmul.f32 1.5, %v146_v10  ;;  %v149_v16 = vld [vmem:[%s2254_s23 + $0x48] sm:$0xff]  ;;  %v735_v17 = vmul.f32 1.5, %v147_v12  ;;  %v150_v18 = vld [vmem:[%s2254_s23 + $0x50] sm:$0xff] }
  0x2e   : > { %1317 = vst [vmem:[%s2267_s16 + $0x8] sm:$0xff] %v729_v4  ;;  %v736_v19 = vmul.f32 1.5, %v148_v14  ;;  %v151_v20 = vld [vmem:[%s2254_s23 + $0x58] sm:$0xff]  ;;  %v737_v21 = vmul.f32 1.5, %v149_v16  ;;  %v152_v22 = vld [vmem:[%s2254_s23 + $0x60] sm:$0xff]  ;;  %v738_v23 = vmul.f32 1.5, %v150_v18 }
  0x2f   : > { %1318 = vst [vmem:[%s2267_s16 + $0x10] sm:$0xff] %v730_v5  ;;  %v153_v24 = vld [vmem:[%s2254_s23 + $0x68] sm:$0xff]  ;;  %v739_v25 = vmul.f32 1.5, %v151_v20  ;;  %v154_v26 = vld [vmem:[%s2254_s23 + $0x70] sm:$0xff]  ;;  %v740_v27 = vmul.f32 1.5, %v152_v22  ;;  %v155_v28 = vld [vmem:[%s2254_s23 + $0x78] sm:$0xff] }
  0x30   : > { %1319 = vst [vmem:[%s2267_s16 + $0x18] sm:$0xff] %v731_v9  ;;  %v741_v29 = vmul.f32 1.5, %v153_v24  ;;  %v156_v30 = vld [vmem:[%s2254_s23 + $0x80] sm:$0xff]  ;;  %v742_v31 = vmul.f32 1.5, %v154_v26  ;;  %v157_v32 = vld [vmem:[%s2254_s23 + $0x88] sm:$0xff]  ;;  %v743_v33 = vmul.f32 1.5, %v155_v28 }
  0x31   : > { %1320 = vst [vmem:[%s2267_s16 + $0x20] sm:$0xff] %v732_v11  ;;  %v158_v34 = vld [vmem:[%s2254_s23 + $0x90] sm:$0xff]  ;;  %v744_v35 = vmul.f32 1.5, %v156_v30  ;;  %v159_v36 = vld [vmem:[%s2254_s23 + $0x98] sm:$0xff]  ;;  %v745_v37 = vmul.f32 1.5, %v157_v32  ;;  %v160_v38 = vld [vmem:[%s2254_s23 + $0xa0] sm:$0xff] }
  0x32   : > { %1321 = vst [vmem:[%s2267_s16 + $0x28] sm:$0xff] %v733_v13  ;;  %v746_v39 = vmul.f32 1.5, %v158_v34  ;;  %v161_v40 = vld [vmem:[%s2254_s23 + $0xa8] sm:$0xff]  ;;  %v747_v41 = vmul.f32 1.5, %v159_v36  ;;  %v162_v42 = vld [vmem:[%s2254_s23 + $0xb0] sm:$0xff]  ;;  %v748_v43 = vmul.f32 1.5, %v160_v38 }
  0x33   : > { %1322 = vst [vmem:[%s2267_s16 + $0x30] sm:$0xff] %v734_v15  ;;  %v163_v44 = vld [vmem:[%s2254_s23 + $0xb8] sm:$0xff]  ;;  %v749_v45 = vmul.f32 1.5, %v161_v40  ;;  %v164_v46 = vld [vmem:[%s2254_s23 + $0xc0] sm:$0xff]  ;;  %v750_v47 = vmul.f32 1.5, %v162_v42  ;;  %v165_v48 = vld [vmem:[%s2254_s23 + $0xc8] sm:$0xff] }
  0x34   : > { %1323 = vst [vmem:[%s2267_s16 + $0x38] sm:$0xff] %v735_v17  ;;  %v751_v49 = vmul.f32 1.5, %v163_v44  ;;  %v166_v50 = vld [vmem:[%s2254_s23 + $0xd0] sm:$0xff]  ;;  %v752_v51 = vmul.f32 1.5, %v164_v46  ;;  %v167_v52 = vld [vmem:[%s2254_s23 + $0xd8] sm:$0xff]  ;;  %v753_v53 = vmul.f32 1.5, %v165_v48 }
  0x35   : > { %1324 = vst [vmem:[%s2267_s16 + $0x40] sm:$0xff] %v736_v19  ;;  %v168_v54 = vld [vmem:[%s2254_s23 + $0xe0] sm:$0xff]  ;;  %v754_v55 = vmul.f32 1.5, %v166_v50  ;;  %v169_v56 = vld [vmem:[%s2254_s23 + $0xe8] sm:$0xff]  ;;  %v755_v57 = vmul.f32 1.5, %v167_v52  ;;  %v170_v58 = vld [vmem:[%s2254_s23 + $0xf0] sm:$0xff] }
  0x36   : > { %1325 = vst [vmem:[%s2267_s16 + $0x48] sm:$0xff] %v737_v21  ;;  %v756_v59 = vmul.f32 1.5, %v168_v54  ;;  %v171_v60 = vld [vmem:[%s2254_s23 + $0xf8] sm:$0xff]  ;;  %v757_v61 = vmul.f32 1.5, %v169_v56  ;;  %v172_v62 = vld [vmem:[%s2254_s23 + $0x100] sm:$0xff]  ;;  %v758_v63 = vmul.f32 1.5, %v170_v58 }
  0x37   : > { %1326 = vst [vmem:[%s2267_s16 + $0x50] sm:$0xff] %v738_v23  ;;  %v173_v0 = vld [vmem:[%s2254_s23 + $0x108] sm:$0xff]  ;;  %v759_v1 = vmul.f32 1.5, %v171_v60  ;;  %v174_v2 = vld [vmem:[%s2254_s23 + $0x110] sm:$0xff]  ;;  %v760_v3 = vmul.f32 1.5, %v172_v62  ;;  %v175_v4 = vld [vmem:[%s2254_s23 + $0x118] sm:$0xff] }
  0x38   : > { %1327 = vst [vmem:[%s2267_s16 + $0x58] sm:$0xff] %v739_v25  ;;  %v761_v5 = vmul.f32 1.5, %v173_v0  ;;  %v176_v6 = vld [vmem:[%s2254_s23 + $0x120] sm:$0xff]  ;;  %v762_v7 = vmul.f32 1.5, %v174_v2  ;;  %v177_v8 = vld [vmem:[%s2254_s23 + $0x128] sm:$0xff]  ;;  %v763_v9 = vmul.f32 1.5, %v175_v4 }
  0x39   : > { %1328 = vst [vmem:[%s2267_s16 + $0x60] sm:$0xff] %v740_v27  ;;  %v178_v10 = vld [vmem:[%s2254_s23 + $0x130] sm:$0xff]  ;;  %v764_v11 = vmul.f32 1.5, %v176_v6  ;;  %v179_v12 = vld [vmem:[%s2254_s23 + $0x138] sm:$0xff]  ;;  %v765_v13 = vmul.f32 1.5, %v177_v8  ;;  %v180_v14 = vld [vmem:[%s2254_s23 + $0x140] sm:$0xff] }
  0x3a   : > { %1329 = vst [vmem:[%s2267_s16 + $0x68] sm:$0xff] %v741_v29  ;;  %v766_v15 = vmul.f32 1.5, %v178_v10  ;;  %v181_v16 = vld [vmem:[%s2254_s23 + $0x148] sm:$0xff]  ;;  %v767_v17 = vmul.f32 1.5, %v179_v12  ;;  %v182_v18 = vld [vmem:[%s2254_s23 + $0x150] sm:$0xff]  ;;  %v768_v19 = vmul.f32 1.5, %v180_v14 }
  0x3b   : > { %1330 = vst [vmem:[%s2267_s16 + $0x70] sm:$0xff] %v742_v31  ;;  %v183_v20 = vld [vmem:[%s2254_s23 + $0x158] sm:$0xff]  ;;  %v769_v21 = vmul.f32 1.5, %v181_v16  ;;  %v184_v22 = vld [vmem:[%s2254_s23 + $0x160] sm:$0xff]  ;;  %v770_v23 = vmul.f32 1.5, %v182_v18  ;;  %v185_v24 = vld [vmem:[%s2254_s23 + $0x168] sm:$0xff] }
  0x3c   : > { %1331 = vst [vmem:[%s2267_s16 + $0x78] sm:$0xff] %v743_v33  ;;  %v771_v25 = vmul.f32 1.5, %v183_v20  ;;  %v186_v26 = vld [vmem:[%s2254_s23 + $0x170] sm:$0xff]  ;;  %v772_v27 = vmul.f32 1.5, %v184_v22  ;;  %v187_v28 = vld [vmem:[%s2254_s23 + $0x178] sm:$0xff]  ;;  %v773_v29 = vmul.f32 1.5, %v185_v24 }
  0x3d   : > { %1332 = vst [vmem:[%s2267_s16 + $0x80] sm:$0xff] %v744_v35  ;;  %v188_v30 = vld [vmem:[%s2254_s23 + $0x180] sm:$0xff]  ;;  %v774_v31 = vmul.f32 1.5, %v186_v26  ;;  %v189_v32 = vld [vmem:[%s2254_s23 + $0x188] sm:$0xff]  ;;  %v775_v33 = vmul.f32 1.5, %v187_v28  ;;  %v190_v34 = vld [vmem:[%s2254_s23 + $0x190] sm:$0xff] }
  0x3e   : > { %1333 = vst [vmem:[%s2267_s16 + $0x88] sm:$0xff] %v745_v37  ;;  %v776_v35 = vmul.f32 1.5, %v188_v30  ;;  %v191_v36 = vld [vmem:[%s2254_s23 + $0x198] sm:$0xff]  ;;  %v777_v37 = vmul.f32 1.5, %v189_v32  ;;  %v192_v38 = vld [vmem:[%s2254_s23 + $0x1a0] sm:$0xff]  ;;  %v193_v40 = vld [vmem:[%s2254_s23 + $0x1a8] sm:$0xff] }
  0x3f   : > { %1334 = vst [vmem:[%s2267_s16 + $0x90] sm:$0xff] %v746_v39  ;;  %v778_v39 = vmul.f32 1.5, %v190_v34  ;;  %v194_v42 = vld [vmem:[%s2254_s23 + $0x1b0] sm:$0xff]  ;;  %v195_v44 = vld [vmem:[%s2254_s23 + $0x1b8] sm:$0xff]  ;;  %v196_v46 = vld [vmem:[%s2254_s23 + $0x1c0] sm:$0xff]  ;;  %s1920_s28 = sshll.u32 %s1917_s26, 4  ;;  %s1921_s28 = int_to_ptr.hbm [resolvable:$true] %s1920_s28 }
  0x40   : > { %1335 = vst [vmem:[%s2267_s16 + $0x98] sm:$0xff] %v747_v41  ;;  %v779_v41 = vmul.f32 1.5, %v191_v36  ;;  %v197_v48 = vld [vmem:[%s2254_s23 + $0x1c8] sm:$0xff]  ;;  %v198_v50 = vld [vmem:[%s2254_s23 + $0x1d0] sm:$0xff]  ;;  %v199_v52 = vld [vmem:[%s2254_s23 + $0x1d8] sm:$0xff]  ;;  %s1905_s29 = scalar_lea.sflag [#allocation4], %s2250_s20 }
  0x41   : > { %1336 = vst [vmem:[%s2267_s16 + $0xa0] sm:$0xff] %v748_v43  ;;  %v780_v43 = vmul.f32 1.5, %v192_v38  ;;  %v200_v54 = vld [vmem:[%s2254_s23 + $0x1e0] sm:$0xff]  ;;  %v201_v56 = vld [vmem:[%s2254_s23 + $0x1e8] sm:$0xff]  ;;  %v202_v58 = vld [vmem:[%s2254_s23 + $0x1f0] sm:$0xff]  ;;  %s2106_s30 = sshra.s32 %s1921_s28, 4  ;;  %s2107_s30 = int_to_ptr.hbm [resolvable:$true] %s2106_s30 }
  0x42   : > { %1337 = vst [vmem:[%s2267_s16 + $0xa8] sm:$0xff] %v749_v45  ;;  %v781_v45 = vmul.f32 1.5, %v193_v40  ;;  %v203_v60 = vld [vmem:[%s2254_s23 + $0x1f8] sm:$0xff]  ;;  %v204_v62 = vld [vmem:[%s2254_s23 + $0x200] sm:$0xff]  ;;  %v205_v0 = vld [vmem:[%s2254_s23 + $0x208] sm:$0xff]  ;;  %s2108_s2 = scalar_lea.hbm %s2107_s30, 4704  ;;  %p2113_p3 = scmp.lt.s32.totalorder %s2107_s30, %s3473_s1 }
  0x43   : > { %1338 = vst [vmem:[%s2267_s16 + $0xb0] sm:$0xff] %v750_v47  ;;  %v782_v47 = vmul.f32 1.5, %v194_v42  ;;  %v206_v2 = vld [vmem:[%s2254_s23 + $0x210] sm:$0xff]  ;;  %v207_v4 = vld [vmem:[%s2254_s23 + $0x218] sm:$0xff]  ;;  %v208_v6 = vld [vmem:[%s2254_s23 + $0x220] sm:$0xff]  ;;  %p2109_p6 = scmp.ne.s32.totalorder %s2107_s30, %s2108_s2  ;;  %s2112_s5 = scalar_lea.hbm %s3473_s1, 9408 }
  0x44   : > { %1339 = vst [vmem:[%s2267_s16 + $0xb8] sm:$0xff] %v751_v49  ;;  %v783_v49 = vmul.f32 1.5, %v195_v44  ;;  %v209_v8 = vld [vmem:[%s2254_s23 + $0x228] sm:$0xff]  ;;  %v210_v10 = vld [vmem:[%s2254_s23 + $0x230] sm:$0xff]  ;;  %v211_v12 = vld [vmem:[%s2254_s23 + $0x238] sm:$0xff]  ;;  %p2114_p4 = scmp.lt.s32.totalorder %s2112_s5, %s2108_s2 }
  0x45   : > { %1340 = vst [vmem:[%s2267_s16 + $0xc0] sm:$0xff] %v752_v51  ;;  %v784_v51 = vmul.f32 1.5, %v196_v46  ;;  %v212_v14 = vld [vmem:[%s2254_s23 + $0x240] sm:$0xff]  ;;  %v213_v16 = vld [vmem:[%s2254_s23 + $0x248] sm:$0xff]  ;;  %v214_v18 = vld [vmem:[%s2254_s23 + $0x250] sm:$0xff]  ;;  %p2110_p13 = pnand %p2109_p6, %p2220_p11 }
  0x46   : > { %1341 = vst [vmem:[%s2267_s16 + $0xc8] sm:$0xff] %v753_v53  ;;  %v785_v53 = vmul.f32 1.5, %v197_v48  ;;  %v215_v20 = vld [vmem:[%s2254_s23 + $0x258] sm:$0xff]  ;;  %v216_v22 = vld [vmem:[%s2254_s23 + $0x260] sm:$0xff]  ;;  %v217_v24 = vld [vmem:[%s2254_s23 + $0x268] sm:$0xff]  ;;  %p2115_p5 = por %p2114_p4, %p2113_p3 }
  0x47   : > { %1342 = vst [vmem:[%s2267_s16 + $0xd0] sm:$0xff] %v754_v55  ;;  %v786_v55 = vmul.f32 1.5, %v198_v50  ;;  %v218_v26 = vld [vmem:[%s2254_s23 + $0x270] sm:$0xff]  ;;  %v219_v28 = vld [vmem:[%s2254_s23 + $0x278] sm:$0xff]  ;;  %v220_v30 = vld [vmem:[%s2254_s23 + $0x280] sm:$0xff]  ;;  %p2111_p2 = pneg %p2110_p13 }
  0x48   : > { %1343 = vst [vmem:[%s2267_s16 + $0xd8] sm:$0xff] %v755_v57  ;;  %v787_v57 = vmul.f32 1.5, %v199_v52  ;;  %v221_v32 = vld [vmem:[%s2254_s23 + $0x288] sm:$0xff]  ;;  %v222_v34 = vld [vmem:[%s2254_s23 + $0x290] sm:$0xff]  ;;  %v223_v36 = vld [vmem:[%s2254_s23 + $0x298] sm:$0xff] }
  0x49   : > { %1344 = vst [vmem:[%s2267_s16 + $0xe0] sm:$0xff] %v756_v59  ;;  %v788_v59 = vmul.f32 1.5, %v200_v54  ;;  %v224_v38 = vld [vmem:[%s2254_s23 + $0x2a0] sm:$0xff]  ;;  %v225_v40 = vld [vmem:[%s2254_s23 + $0x2a8] sm:$0xff]  ;;  %v226_v42 = vld [vmem:[%s2254_s23 + $0x2b0] sm:$0xff]  ;;  %p2116_p7 = pnand %p2115_p5, %p2111_p2 }
  0x4a   : > { %1345 = vst [vmem:[%s2267_s16 + $0xe8] sm:$0xff] %v757_v61  ;;  %v789_v61 = vmul.f32 1.5, %v201_v56  ;;  %v227_v44 = vld [vmem:[%s2254_s23 + $0x2b8] sm:$0xff]  ;;  %v228_v46 = vld [vmem:[%s2254_s23 + $0x2c0] sm:$0xff]  ;;  %v229_v48 = vld [vmem:[%s2254_s23 + $0x2c8] sm:$0xff] }
  0x4b   : > { %1346 = vst [vmem:[%s2267_s16 + $0xf0] sm:$0xff] %v758_v63  ;;  %v790_v63 = vmul.f32 1.5, %v202_v58  ;;  %v230_v50 = vld [vmem:[%s2254_s23 + $0x2d0] sm:$0xff]  ;;  %v231_v52 = vld [vmem:[%s2254_s23 + $0x2d8] sm:$0xff]  ;;  %v232_v54 = vld [vmem:[%s2254_s23 + $0x2e0] sm:$0xff] }
  0x4c   : > { %1347 = vst [vmem:[%s2267_s16 + $0xf8] sm:$0xff] %v759_v1  ;;  %v791_v1 = vmul.f32 1.5, %v203_v60  ;;  %v233_v56 = vld [vmem:[%s2254_s23 + $0x2e8] sm:$0xff]  ;;  %v234_v58 = vld [vmem:[%s2254_s23 + $0x2f0] sm:$0xff]  ;;  %v235_v60 = vld [vmem:[%s2254_s23 + $0x2f8] sm:$0xff] }
  0x4d   : > { %1348 = vst [vmem:[%s2267_s16 + $0x100] sm:$0xff] %v760_v3  ;;  %v792_v3 = vmul.f32 1.5, %v204_v62  ;;  %v236_v62 = vld [vmem:[%s2254_s23 + $0x300] sm:$0xff] }
  0x4e   : > { %1349 = vst [vmem:[%s2267_s16 + $0x108] sm:$0xff] %v761_v5  ;;  %v793_v5 = vmul.f32 1.5, %v205_v0  ;;  %v237_v0 = vld [vmem:[%s2254_s23 + $0x308] sm:$0xff] }
  0x4f   : > { %1350 = vst [vmem:[%s2267_s16 + $0x110] sm:$0xff] %v762_v7  ;;  %v794_v7 = vmul.f32 1.5, %v206_v2  ;;  %v238_v2 = vld [vmem:[%s2254_s23 + $0x310] sm:$0xff] }
  0x50   : > { %1351 = vst [vmem:[%s2267_s16 + $0x118] sm:$0xff] %v763_v9  ;;  %v795_v9 = vmul.f32 1.5, %v207_v4  ;;  %v239_v4 = vld [vmem:[%s2254_s23 + $0x318] sm:$0xff] }
  0x51   : > { %1352 = vst [vmem:[%s2267_s16 + $0x120] sm:$0xff] %v764_v11  ;;  %v796_v11 = vmul.f32 1.5, %v208_v6  ;;  %v240_v6 = vld [vmem:[%s2254_s23 + $0x320] sm:$0xff] }
  0x52   : > { %1353 = vst [vmem:[%s2267_s16 + $0x128] sm:$0xff] %v765_v13  ;;  %v797_v13 = vmul.f32 1.5, %v209_v8  ;;  %v241_v8 = vld [vmem:[%s2254_s23 + $0x328] sm:$0xff] }
  0x53   : > { %1354 = vst [vmem:[%s2267_s16 + $0x130] sm:$0xff] %v766_v15  ;;  %v798_v15 = vmul.f32 1.5, %v210_v10  ;;  %v242_v10 = vld [vmem:[%s2254_s23 + $0x330] sm:$0xff] }
  0x54   : > { %1355 = vst [vmem:[%s2267_s16 + $0x138] sm:$0xff] %v767_v17  ;;  %v799_v17 = vmul.f32 1.5, %v211_v12  ;;  %v243_v12 = vld [vmem:[%s2254_s23 + $0x338] sm:$0xff] }
  0x55   : > { %1356 = vst [vmem:[%s2267_s16 + $0x140] sm:$0xff] %v768_v19  ;;  %v800_v19 = vmul.f32 1.5, %v212_v14  ;;  %v244_v14 = vld [vmem:[%s2254_s23 + $0x340] sm:$0xff] }
  0x56   : > { %1357 = vst [vmem:[%s2267_s16 + $0x148] sm:$0xff] %v769_v21  ;;  %v801_v21 = vmul.f32 1.5, %v213_v16  ;;  %v245_v16 = vld [vmem:[%s2254_s23 + $0x348] sm:$0xff] }
  0x57   : > { %1358 = vst [vmem:[%s2267_s16 + $0x150] sm:$0xff] %v770_v23  ;;  %v802_v23 = vmul.f32 1.5, %v214_v18  ;;  %v246_v18 = vld [vmem:[%s2254_s23 + $0x350] sm:$0xff] }
  0x58   : > { %1359 = vst [vmem:[%s2267_s16 + $0x158] sm:$0xff] %v771_v25  ;;  %v803_v25 = vmul.f32 1.5, %v215_v20  ;;  %v247_v20 = vld [vmem:[%s2254_s23 + $0x358] sm:$0xff] }
  0x59   : > { %1360 = vst [vmem:[%s2267_s16 + $0x160] sm:$0xff] %v772_v27  ;;  %v804_v27 = vmul.f32 1.5, %v216_v22  ;;  %v248_v22 = vld [vmem:[%s2254_s23 + $0x360] sm:$0xff] }
  0x5a   : > { %1361 = vst [vmem:[%s2267_s16 + $0x168] sm:$0xff] %v773_v29  ;;  %v805_v29 = vmul.f32 1.5, %v217_v24  ;;  %v249_v24 = vld [vmem:[%s2254_s23 + $0x368] sm:$0xff] }
  0x5b   : > { %1362 = vst [vmem:[%s2267_s16 + $0x170] sm:$0xff] %v774_v31  ;;  %v806_v31 = vmul.f32 1.5, %v218_v26  ;;  %v250_v26 = vld [vmem:[%s2254_s23 + $0x370] sm:$0xff] }
  0x5c   : > { %1363 = vst [vmem:[%s2267_s16 + $0x178] sm:$0xff] %v775_v33  ;;  %v807_v33 = vmul.f32 1.5, %v219_v28  ;;  %v251_v28 = vld [vmem:[%s2254_s23 + $0x378] sm:$0xff] }
  0x5d   : > { %1364 = vst [vmem:[%s2267_s16 + $0x180] sm:$0xff] %v776_v35  ;;  %v808_v35 = vmul.f32 1.5, %v220_v30  ;;  %v252_v30 = vld [vmem:[%s2254_s23 + $0x380] sm:$0xff] }
  0x5e   : > { %1365 = vst [vmem:[%s2267_s16 + $0x188] sm:$0xff] %v777_v37  ;;  %v809_v37 = vmul.f32 1.5, %v221_v32  ;;  %v253_v32 = vld [vmem:[%s2254_s23 + $0x388] sm:$0xff] }
  0x5f   : > { %1366 = vst [vmem:[%s2267_s16 + $0x190] sm:$0xff] %v778_v39  ;;  %v810_v39 = vmul.f32 1.5, %v222_v34  ;;  %v254_v34 = vld [vmem:[%s2254_s23 + $0x390] sm:$0xff] }
  0x60   : > { %1367 = vst [vmem:[%s2267_s16 + $0x198] sm:$0xff] %v779_v41  ;;  %v811_v41 = vmul.f32 1.5, %v223_v36  ;;  %v255_v36 = vld [vmem:[%s2254_s23 + $0x398] sm:$0xff] }
  0x61   : > { %1368 = vst [vmem:[%s2267_s16 + $0x1a0] sm:$0xff] %v780_v43  ;;  %v812_v43 = vmul.f32 1.5, %v224_v38  ;;  %v256_v38 = vld [vmem:[%s2254_s23 + $0x3a0] sm:$0xff] }
  0x62   : > { %1369 = vst [vmem:[%s2267_s16 + $0x1a8] sm:$0xff] %v781_v45  ;;  %v813_v45 = vmul.f32 1.5, %v225_v40  ;;  %v257_v40 = vld [vmem:[%s2254_s23 + $0x3a8] sm:$0xff] }
  0x63   : > { %1370 = vst [vmem:[%s2267_s16 + $0x1b0] sm:$0xff] %v782_v47  ;;  %v814_v47 = vmul.f32 1.5, %v226_v42  ;;  %v258_v42 = vld [vmem:[%s2254_s23 + $0x3b0] sm:$0xff] }
  0x64   : > { %1371 = vst [vmem:[%s2267_s16 + $0x1b8] sm:$0xff] %v783_v49  ;;  %v815_v49 = vmul.f32 1.5, %v227_v44  ;;  %v259_v44 = vld [vmem:[%s2254_s23 + $0x3b8] sm:$0xff] }
  0x65   : > { %1372 = vst [vmem:[%s2267_s16 + $0x1c0] sm:$0xff] %v784_v51  ;;  %v816_v51 = vmul.f32 1.5, %v228_v46  ;;  %v260_v46 = vld [vmem:[%s2254_s23 + $0x3c0] sm:$0xff] }
  0x66   : > { %1373 = vst [vmem:[%s2267_s16 + $0x1c8] sm:$0xff] %v785_v53  ;;  %v817_v53 = vmul.f32 1.5, %v229_v48  ;;  %v261_v48 = vld [vmem:[%s2254_s23 + $0x3c8] sm:$0xff] }
  0x67   : > { %1374 = vst [vmem:[%s2267_s16 + $0x1d0] sm:$0xff] %v786_v55  ;;  %v818_v55 = vmul.f32 1.5, %v230_v50  ;;  %v262_v50 = vld [vmem:[%s2254_s23 + $0x3d0] sm:$0xff] }
  0x68   : > { %1375 = vst [vmem:[%s2267_s16 + $0x1d8] sm:$0xff] %v787_v57  ;;  %v819_v57 = vmul.f32 1.5, %v231_v52  ;;  %v263_v52 = vld [vmem:[%s2254_s23 + $0x3d8] sm:$0xff] }
  0x69   : > { %1376 = vst [vmem:[%s2267_s16 + $0x1e0] sm:$0xff] %v788_v59  ;;  %v820_v59 = vmul.f32 1.5, %v232_v54  ;;  %v264_v54 = vld [vmem:[%s2254_s23 + $0x3e0] sm:$0xff] }
  0x6a   : > { %1377 = vst [vmem:[%s2267_s16 + $0x1e8] sm:$0xff] %v789_v61  ;;  %v821_v61 = vmul.f32 1.5, %v233_v56  ;;  %v265_v56 = vld [vmem:[%s2254_s23 + $0x3e8] sm:$0xff] }
  0x6b   : > { %1378 = vst [vmem:[%s2267_s16 + $0x1f0] sm:$0xff] %v790_v63  ;;  %v822_v63 = vmul.f32 1.5, %v234_v58  ;;  %v266_v58 = vld [vmem:[%s2254_s23 + $0x3f0] sm:$0xff] }
  0x6c   : > { %1379 = vst [vmem:[%s2267_s16 + $0x1f8] sm:$0xff] %v791_v1  ;;  %v823_v1 = vmul.f32 1.5, %v235_v60  ;;  %v267_v60 = vld [vmem:[%s2254_s23 + $0x3f8] sm:$0xff] }
  0x6d   : > { %1380 = vst [vmem:[%s2267_s16 + $0x200] sm:$0xff] %v792_v3  ;;  %v824_v3 = vmul.f32 1.5, %v236_v62  ;;  %v268_v62 = vld [vmem:[%s2254_s23 + $0x400] sm:$0xff] }
  0x6e   : > { %1381 = vst [vmem:[%s2267_s16 + $0x208] sm:$0xff] %v793_v5  ;;  %v825_v5 = vmul.f32 1.5, %v237_v0  ;;  %v269_v0 = vld [vmem:[%s2254_s23 + $0x408] sm:$0xff] }
  0x6f   : > { %1382 = vst [vmem:[%s2267_s16 + $0x210] sm:$0xff] %v794_v7  ;;  %v826_v7 = vmul.f32 1.5, %v238_v2  ;;  %v270_v2 = vld [vmem:[%s2254_s23 + $0x410] sm:$0xff] }
  0x70   : > { %1383 = vst [vmem:[%s2267_s16 + $0x218] sm:$0xff] %v795_v9  ;;  %v827_v9 = vmul.f32 1.5, %v239_v4  ;;  %v271_v4 = vld [vmem:[%s2254_s23 + $0x418] sm:$0xff] }
  0x71   : > { %1384 = vst [vmem:[%s2267_s16 + $0x220] sm:$0xff] %v796_v11  ;;  %v828_v11 = vmul.f32 1.5, %v240_v6  ;;  %v272_v6 = vld [vmem:[%s2254_s23 + $0x420] sm:$0xff] }
  0x72   : > { %1385 = vst [vmem:[%s2267_s16 + $0x228] sm:$0xff] %v797_v13  ;;  %v829_v13 = vmul.f32 1.5, %v241_v8  ;;  %v273_v8 = vld [vmem:[%s2254_s23 + $0x428] sm:$0xff] }
  0x73   : > { %1386 = vst [vmem:[%s2267_s16 + $0x230] sm:$0xff] %v798_v15  ;;  %v830_v15 = vmul.f32 1.5, %v242_v10  ;;  %v274_v10 = vld [vmem:[%s2254_s23 + $0x430] sm:$0xff] }
  0x74   : > { %1387 = vst [vmem:[%s2267_s16 + $0x238] sm:$0xff] %v799_v17  ;;  %v831_v17 = vmul.f32 1.5, %v243_v12  ;;  %v275_v12 = vld [vmem:[%s2254_s23 + $0x438] sm:$0xff] }
  0x75   : > { %1388 = vst [vmem:[%s2267_s16 + $0x240] sm:$0xff] %v800_v19  ;;  %v832_v19 = vmul.f32 1.5, %v244_v14  ;;  %v276_v14 = vld [vmem:[%s2254_s23 + $0x440] sm:$0xff] }
  0x76   : > { %1389 = vst [vmem:[%s2267_s16 + $0x248] sm:$0xff] %v801_v21  ;;  %v833_v21 = vmul.f32 1.5, %v245_v16  ;;  %v277_v16 = vld [vmem:[%s2254_s23 + $0x448] sm:$0xff] }
  0x77   : > { %1390 = vst [vmem:[%s2267_s16 + $0x250] sm:$0xff] %v802_v23  ;;  %v834_v23 = vmul.f32 1.5, %v246_v18  ;;  %v278_v18 = vld [vmem:[%s2254_s23 + $0x450] sm:$0xff] }
  0x78   : > { %1391 = vst [vmem:[%s2267_s16 + $0x258] sm:$0xff] %v803_v25  ;;  %v835_v25 = vmul.f32 1.5, %v247_v20  ;;  %v279_v20 = vld [vmem:[%s2254_s23 + $0x458] sm:$0xff] }
  0x79   : > { %1392 = vst [vmem:[%s2267_s16 + $0x260] sm:$0xff] %v804_v27  ;;  %v836_v27 = vmul.f32 1.5, %v248_v22  ;;  %v280_v22 = vld [vmem:[%s2254_s23 + $0x460] sm:$0xff] }
  0x7a   : > { %1393 = vst [vmem:[%s2267_s16 + $0x268] sm:$0xff] %v805_v29  ;;  %v837_v29 = vmul.f32 1.5, %v249_v24  ;;  %v281_v24 = vld [vmem:[%s2254_s23 + $0x468] sm:$0xff] }
  0x7b   : > { %1394 = vst [vmem:[%s2267_s16 + $0x270] sm:$0xff] %v806_v31  ;;  %v838_v31 = vmul.f32 1.5, %v250_v26  ;;  %v282_v26 = vld [vmem:[%s2254_s23 + $0x470] sm:$0xff] }
  0x7c   : > { %1395 = vst [vmem:[%s2267_s16 + $0x278] sm:$0xff] %v807_v33  ;;  %v839_v33 = vmul.f32 1.5, %v251_v28  ;;  %v283_v28 = vld [vmem:[%s2254_s23 + $0x478] sm:$0xff] }
  0x7d   : > { %1396 = vst [vmem:[%s2267_s16 + $0x280] sm:$0xff] %v808_v35  ;;  %v840_v35 = vmul.f32 1.5, %v252_v30  ;;  %v284_v30 = vld [vmem:[%s2254_s23 + $0x480] sm:$0xff] }
  0x7e   : > { %1397 = vst [vmem:[%s2267_s16 + $0x288] sm:$0xff] %v809_v37  ;;  %v841_v37 = vmul.f32 1.5, %v253_v32  ;;  %v285_v32 = vld [vmem:[%s2254_s23 + $0x488] sm:$0xff] }
  0x7f   : > { %1398 = vst [vmem:[%s2267_s16 + $0x290] sm:$0xff] %v810_v39  ;;  %v842_v39 = vmul.f32 1.5, %v254_v34  ;;  %v286_v34 = vld [vmem:[%s2254_s23 + $0x490] sm:$0xff] }
  0x80   : > { %1399 = vst [vmem:[%s2267_s16 + $0x298] sm:$0xff] %v811_v41  ;;  %v843_v41 = vmul.f32 1.5, %v255_v36  ;;  %v287_v36 = vld [vmem:[%s2254_s23 + $0x498] sm:$0xff] }
  0x81   : > { %1400 = vst [vmem:[%s2267_s16 + $0x2a0] sm:$0xff] %v812_v43  ;;  %v844_v43 = vmul.f32 1.5, %v256_v38  ;;  %v288_v38 = vld [vmem:[%s2254_s23 + $0x4a0] sm:$0xff] }
  0x82   : > { %1401 = vst [vmem:[%s2267_s16 + $0x2a8] sm:$0xff] %v813_v45  ;;  %v845_v45 = vmul.f32 1.5, %v257_v40  ;;  %v289_v40 = vld [vmem:[%s2254_s23 + $0x4a8] sm:$0xff] }
  0x83   : > { %1402 = vst [vmem:[%s2267_s16 + $0x2b0] sm:$0xff] %v814_v47  ;;  %v846_v47 = vmul.f32 1.5, %v258_v42  ;;  %v290_v42 = vld [vmem:[%s2254_s23 + $0x4b0] sm:$0xff] }
  0x84   : > { %1403 = vst [vmem:[%s2267_s16 + $0x2b8] sm:$0xff] %v815_v49  ;;  %v847_v49 = vmul.f32 1.5, %v259_v44  ;;  %v291_v44 = vld [vmem:[%s2254_s23 + $0x4b8] sm:$0xff] }
  0x85   : > { %1404 = vst [vmem:[%s2267_s16 + $0x2c0] sm:$0xff] %v816_v51  ;;  %v848_v51 = vmul.f32 1.5, %v260_v46  ;;  %v292_v46 = vld [vmem:[%s2254_s23 + $0x4c0] sm:$0xff] }
  0x86   : > { %1405 = vst [vmem:[%s2267_s16 + $0x2c8] sm:$0xff] %v817_v53  ;;  %v849_v53 = vmul.f32 1.5, %v261_v48  ;;  %v293_v48 = vld [vmem:[%s2254_s23 + $0x4c8] sm:$0xff] }
  0x87   : > { %1406 = vst [vmem:[%s2267_s16 + $0x2d0] sm:$0xff] %v818_v55  ;;  %v850_v55 = vmul.f32 1.5, %v262_v50  ;;  %v294_v50 = vld [vmem:[%s2254_s23 + $0x4d0] sm:$0xff] }
  0x88   : > { %1407 = vst [vmem:[%s2267_s16 + $0x2d8] sm:$0xff] %v819_v57  ;;  %v851_v57 = vmul.f32 1.5, %v263_v52  ;;  %v295_v52 = vld [vmem:[%s2254_s23 + $0x4d8] sm:$0xff] }
  0x89   : > { %1408 = vst [vmem:[%s2267_s16 + $0x2e0] sm:$0xff] %v820_v59  ;;  %v852_v59 = vmul.f32 1.5, %v264_v54  ;;  %v296_v54 = vld [vmem:[%s2254_s23 + $0x4e0] sm:$0xff] }
  0x8a   : > { %1409 = vst [vmem:[%s2267_s16 + $0x2e8] sm:$0xff] %v821_v61  ;;  %v853_v61 = vmul.f32 1.5, %v265_v56  ;;  %v297_v56 = vld [vmem:[%s2254_s23 + $0x4e8] sm:$0xff] }
  0x8b   : > { %1410 = vst [vmem:[%s2267_s16 + $0x2f0] sm:$0xff] %v822_v63  ;;  %v854_v63 = vmul.f32 1.5, %v266_v58  ;;  %v298_v58 = vld [vmem:[%s2254_s23 + $0x4f0] sm:$0xff] }
  0x8c   : > { %1411 = vst [vmem:[%s2267_s16 + $0x2f8] sm:$0xff] %v823_v1  ;;  %v855_v1 = vmul.f32 1.5, %v267_v60  ;;  %v299_v60 = vld [vmem:[%s2254_s23 + $0x4f8] sm:$0xff] }
  0x8d   : > { %1412 = vst [vmem:[%s2267_s16 + $0x300] sm:$0xff] %v824_v3  ;;  %v856_v3 = vmul.f32 1.5, %v268_v62  ;;  %v300_v62 = vld [vmem:[%s2254_s23 + $0x500] sm:$0xff] }
  0x8e   : > { %1413 = vst [vmem:[%s2267_s16 + $0x308] sm:$0xff] %v825_v5  ;;  %v857_v5 = vmul.f32 1.5, %v269_v0  ;;  %v301_v0 = vld [vmem:[%s2254_s23 + $0x508] sm:$0xff] }
  0x8f   : > { %1414 = vst [vmem:[%s2267_s16 + $0x310] sm:$0xff] %v826_v7  ;;  %v858_v7 = vmul.f32 1.5, %v270_v2  ;;  %v302_v2 = vld [vmem:[%s2254_s23 + $0x510] sm:$0xff] }
  0x90   : > { %1415 = vst [vmem:[%s2267_s16 + $0x318] sm:$0xff] %v827_v9  ;;  %v859_v9 = vmul.f32 1.5, %v271_v4  ;;  %v303_v4 = vld [vmem:[%s2254_s23 + $0x518] sm:$0xff] }
  0x91   : > { %1416 = vst [vmem:[%s2267_s16 + $0x320] sm:$0xff] %v828_v11  ;;  %v860_v11 = vmul.f32 1.5, %v272_v6  ;;  %v304_v6 = vld [vmem:[%s2254_s23 + $0x520] sm:$0xff] }
  0x92   : > { %1417 = vst [vmem:[%s2267_s16 + $0x328] sm:$0xff] %v829_v13  ;;  %v861_v13 = vmul.f32 1.5, %v273_v8  ;;  %v305_v8 = vld [vmem:[%s2254_s23 + $0x528] sm:$0xff] }
  0x93   : > { %1418 = vst [vmem:[%s2267_s16 + $0x330] sm:$0xff] %v830_v15  ;;  %v862_v15 = vmul.f32 1.5, %v274_v10  ;;  %v306_v10 = vld [vmem:[%s2254_s23 + $0x530] sm:$0xff] }
  0x94   : > { %1419 = vst [vmem:[%s2267_s16 + $0x338] sm:$0xff] %v831_v17  ;;  %v863_v17 = vmul.f32 1.5, %v275_v12  ;;  %v307_v12 = vld [vmem:[%s2254_s23 + $0x538] sm:$0xff] }
  0x95   : > { %1420 = vst [vmem:[%s2267_s16 + $0x340] sm:$0xff] %v832_v19  ;;  %v864_v19 = vmul.f32 1.5, %v276_v14  ;;  %v308_v14 = vld [vmem:[%s2254_s23 + $0x540] sm:$0xff] }
  0x96   : > { %1421 = vst [vmem:[%s2267_s16 + $0x348] sm:$0xff] %v833_v21  ;;  %v865_v21 = vmul.f32 1.5, %v277_v16  ;;  %v309_v16 = vld [vmem:[%s2254_s23 + $0x548] sm:$0xff] }
  0x97   : > { %1422 = vst [vmem:[%s2267_s16 + $0x350] sm:$0xff] %v834_v23  ;;  %v866_v23 = vmul.f32 1.5, %v278_v18  ;;  %v310_v18 = vld [vmem:[%s2254_s23 + $0x550] sm:$0xff] }
  0x98   : > { %1423 = vst [vmem:[%s2267_s16 + $0x358] sm:$0xff] %v835_v25  ;;  %v867_v25 = vmul.f32 1.5, %v279_v20  ;;  %v311_v20 = vld [vmem:[%s2254_s23 + $0x558] sm:$0xff] }
  0x99   : > { %1424 = vst [vmem:[%s2267_s16 + $0x360] sm:$0xff] %v836_v27  ;;  %v868_v27 = vmul.f32 1.5, %v280_v22  ;;  %v312_v22 = vld [vmem:[%s2254_s23 + $0x560] sm:$0xff] }
  0x9a   : > { %1425 = vst [vmem:[%s2267_s16 + $0x368] sm:$0xff] %v837_v29  ;;  %v869_v29 = vmul.f32 1.5, %v281_v24  ;;  %v313_v24 = vld [vmem:[%s2254_s23 + $0x568] sm:$0xff] }
  0x9b   : > { %1426 = vst [vmem:[%s2267_s16 + $0x370] sm:$0xff] %v838_v31  ;;  %v870_v31 = vmul.f32 1.5, %v282_v26  ;;  %v314_v26 = vld [vmem:[%s2254_s23 + $0x570] sm:$0xff] }
  0x9c   : > { %1427 = vst [vmem:[%s2267_s16 + $0x378] sm:$0xff] %v839_v33  ;;  %v871_v33 = vmul.f32 1.5, %v283_v28  ;;  %v315_v28 = vld [vmem:[%s2254_s23 + $0x578] sm:$0xff] }
  0x9d   : > { %1428 = vst [vmem:[%s2267_s16 + $0x380] sm:$0xff] %v840_v35  ;;  %v872_v35 = vmul.f32 1.5, %v284_v30  ;;  %v316_v30 = vld [vmem:[%s2254_s23 + $0x580] sm:$0xff] }
  0x9e   : > { %1429 = vst [vmem:[%s2267_s16 + $0x388] sm:$0xff] %v841_v37  ;;  %v873_v37 = vmul.f32 1.5, %v285_v32  ;;  %v317_v32 = vld [vmem:[%s2254_s23 + $0x588] sm:$0xff] }
  0x9f   : > { %1430 = vst [vmem:[%s2267_s16 + $0x390] sm:$0xff] %v842_v39  ;;  %v874_v39 = vmul.f32 1.5, %v286_v34  ;;  %v318_v34 = vld [vmem:[%s2254_s23 + $0x590] sm:$0xff] }
  0xa0   : > { %1431 = vst [vmem:[%s2267_s16 + $0x398] sm:$0xff] %v843_v41  ;;  %v875_v41 = vmul.f32 1.5, %v287_v36  ;;  %v319_v36 = vld [vmem:[%s2254_s23 + $0x598] sm:$0xff] }
  0xa1   : > { %1432 = vst [vmem:[%s2267_s16 + $0x3a0] sm:$0xff] %v844_v43  ;;  %v876_v43 = vmul.f32 1.5, %v288_v38  ;;  %v320_v38 = vld [vmem:[%s2254_s23 + $0x5a0] sm:$0xff] }
  0xa2   : > { %1433 = vst [vmem:[%s2267_s16 + $0x3a8] sm:$0xff] %v845_v45  ;;  %v877_v45 = vmul.f32 1.5, %v289_v40  ;;  %v321_v40 = vld [vmem:[%s2254_s23 + $0x5a8] sm:$0xff] }
  0xa3   : > { %1434 = vst [vmem:[%s2267_s16 + $0x3b0] sm:$0xff] %v846_v47  ;;  %v878_v47 = vmul.f32 1.5, %v290_v42  ;;  %v322_v42 = vld [vmem:[%s2254_s23 + $0x5b0] sm:$0xff] }
  0xa4   : > { %1435 = vst [vmem:[%s2267_s16 + $0x3b8] sm:$0xff] %v847_v49  ;;  %v879_v49 = vmul.f32 1.5, %v291_v44  ;;  %v323_v44 = vld [vmem:[%s2254_s23 + $0x5b8] sm:$0xff] }
  0xa5   : > { %1436 = vst [vmem:[%s2267_s16 + $0x3c0] sm:$0xff] %v848_v51  ;;  %v880_v51 = vmul.f32 1.5, %v292_v46  ;;  %v324_v46 = vld [vmem:[%s2254_s23 + $0x5c0] sm:$0xff] }
  0xa6   : > { %1437 = vst [vmem:[%s2267_s16 + $0x3c8] sm:$0xff] %v849_v53  ;;  %v881_v53 = vmul.f32 1.5, %v293_v48  ;;  %v325_v48 = vld [vmem:[%s2254_s23 + $0x5c8] sm:$0xff] }
  0xa7   : > { %1438 = vst [vmem:[%s2267_s16 + $0x3d0] sm:$0xff] %v850_v55  ;;  %v882_v55 = vmul.f32 1.5, %v294_v50  ;;  %v326_v50 = vld [vmem:[%s2254_s23 + $0x5d0] sm:$0xff] }
  0xa8   : > { %1439 = vst [vmem:[%s2267_s16 + $0x3d8] sm:$0xff] %v851_v57  ;;  %v883_v57 = vmul.f32 1.5, %v295_v52  ;;  %v327_v52 = vld [vmem:[%s2254_s23 + $0x5d8] sm:$0xff] }
  0xa9   : > { %1440 = vst [vmem:[%s2267_s16 + $0x3e0] sm:$0xff] %v852_v59  ;;  %v884_v59 = vmul.f32 1.5, %v296_v54  ;;  %v328_v54 = vld [vmem:[%s2254_s23 + $0x5e0] sm:$0xff] }
  0xaa   : > { %1441 = vst [vmem:[%s2267_s16 + $0x3e8] sm:$0xff] %v853_v61  ;;  %v885_v61 = vmul.f32 1.5, %v297_v56  ;;  %v329_v56 = vld [vmem:[%s2254_s23 + $0x5e8] sm:$0xff] }
  0xab   : > { %1442 = vst [vmem:[%s2267_s16 + $0x3f0] sm:$0xff] %v854_v63  ;;  %v886_v63 = vmul.f32 1.5, %v298_v58  ;;  %v330_v58 = vld [vmem:[%s2254_s23 + $0x5f0] sm:$0xff] }
  0xac   : > { %1443 = vst [vmem:[%s2267_s16 + $0x3f8] sm:$0xff] %v855_v1  ;;  %v887_v1 = vmul.f32 1.5, %v299_v60  ;;  %v331_v60 = vld [vmem:[%s2254_s23 + $0x5f8] sm:$0xff] }
  0xad   : > { %1444 = vst [vmem:[%s2267_s16 + $0x400] sm:$0xff] %v856_v3  ;;  %v888_v3 = vmul.f32 1.5, %v300_v62  ;;  %v332_v62 = vld [vmem:[%s2254_s23 + $0x600] sm:$0xff] }
  0xae   : > { %1445 = vst [vmem:[%s2267_s16 + $0x408] sm:$0xff] %v857_v5  ;;  %v889_v5 = vmul.f32 1.5, %v301_v0  ;;  %v333_v0 = vld [vmem:[%s2254_s23 + $0x608] sm:$0xff] }
  0xaf   : > { %1446 = vst [vmem:[%s2267_s16 + $0x410] sm:$0xff] %v858_v7  ;;  %v890_v7 = vmul.f32 1.5, %v302_v2  ;;  %v334_v2 = vld [vmem:[%s2254_s23 + $0x610] sm:$0xff] }
  0xb0   : > { %1447 = vst [vmem:[%s2267_s16 + $0x418] sm:$0xff] %v859_v9  ;;  %v891_v9 = vmul.f32 1.5, %v303_v4  ;;  %v335_v4 = vld [vmem:[%s2254_s23 + $0x618] sm:$0xff] }
  0xb1   : > { %1448 = vst [vmem:[%s2267_s16 + $0x420] sm:$0xff] %v860_v11  ;;  %v892_v11 = vmul.f32 1.5, %v304_v6  ;;  %v336_v6 = vld [vmem:[%s2254_s23 + $0x620] sm:$0xff] }
  0xb2   : > { %1449 = vst [vmem:[%s2267_s16 + $0x428] sm:$0xff] %v861_v13  ;;  %v893_v13 = vmul.f32 1.5, %v305_v8  ;;  %v337_v8 = vld [vmem:[%s2254_s23 + $0x628] sm:$0xff] }
  0xb3   : > { %1450 = vst [vmem:[%s2267_s16 + $0x430] sm:$0xff] %v862_v15  ;;  %v894_v15 = vmul.f32 1.5, %v306_v10  ;;  %v338_v10 = vld [vmem:[%s2254_s23 + $0x630] sm:$0xff] }
  0xb4   : > { %1451 = vst [vmem:[%s2267_s16 + $0x438] sm:$0xff] %v863_v17  ;;  %v895_v17 = vmul.f32 1.5, %v307_v12  ;;  %v339_v12 = vld [vmem:[%s2254_s23 + $0x638] sm:$0xff] }
  0xb5   : > { %1452 = vst [vmem:[%s2267_s16 + $0x440] sm:$0xff] %v864_v19  ;;  %v896_v19 = vmul.f32 1.5, %v308_v14  ;;  %v340_v14 = vld [vmem:[%s2254_s23 + $0x640] sm:$0xff] }
  0xb6   : > { %1453 = vst [vmem:[%s2267_s16 + $0x448] sm:$0xff] %v865_v21  ;;  %v897_v21 = vmul.f32 1.5, %v309_v16  ;;  %v341_v16 = vld [vmem:[%s2254_s23 + $0x648] sm:$0xff] }
  0xb7   : > { %1454 = vst [vmem:[%s2267_s16 + $0x450] sm:$0xff] %v866_v23  ;;  %v898_v23 = vmul.f32 1.5, %v310_v18  ;;  %v342_v18 = vld [vmem:[%s2254_s23 + $0x650] sm:$0xff] }
  0xb8   : > { %1455 = vst [vmem:[%s2267_s16 + $0x458] sm:$0xff] %v867_v25  ;;  %v899_v25 = vmul.f32 1.5, %v311_v20  ;;  %v343_v20 = vld [vmem:[%s2254_s23 + $0x658] sm:$0xff] }
  0xb9   : > { %1456 = vst [vmem:[%s2267_s16 + $0x460] sm:$0xff] %v868_v27  ;;  %v900_v27 = vmul.f32 1.5, %v312_v22  ;;  %v344_v22 = vld [vmem:[%s2254_s23 + $0x660] sm:$0xff] }
  0xba   : > { %1457 = vst [vmem:[%s2267_s16 + $0x468] sm:$0xff] %v869_v29  ;;  %v901_v29 = vmul.f32 1.5, %v313_v24  ;;  %v345_v24 = vld [vmem:[%s2254_s23 + $0x668] sm:$0xff] }
  0xbb   : > { %1458 = vst [vmem:[%s2267_s16 + $0x470] sm:$0xff] %v870_v31  ;;  %v902_v31 = vmul.f32 1.5, %v314_v26  ;;  %v346_v26 = vld [vmem:[%s2254_s23 + $0x670] sm:$0xff] }
  0xbc   : > { %1459 = vst [vmem:[%s2267_s16 + $0x478] sm:$0xff] %v871_v33  ;;  %v903_v33 = vmul.f32 1.5, %v315_v28  ;;  %v347_v28 = vld [vmem:[%s2254_s23 + $0x678] sm:$0xff] }
  0xbd   : > { %1460 = vst [vmem:[%s2267_s16 + $0x480] sm:$0xff] %v872_v35  ;;  %v904_v35 = vmul.f32 1.5, %v316_v30  ;;  %v348_v30 = vld [vmem:[%s2254_s23 + $0x680] sm:$0xff] }
  0xbe   : > { %1461 = vst [vmem:[%s2267_s16 + $0x488] sm:$0xff] %v873_v37  ;;  %v905_v37 = vmul.f32 1.5, %v317_v32  ;;  %v349_v32 = vld [vmem:[%s2254_s23 + $0x688] sm:$0xff] }
  0xbf   : > { %1462 = vst [vmem:[%s2267_s16 + $0x490] sm:$0xff] %v874_v39  ;;  %v906_v39 = vmul.f32 1.5, %v318_v34  ;;  %v350_v34 = vld [vmem:[%s2254_s23 + $0x690] sm:$0xff] }
  0xc0   : > { %1463 = vst [vmem:[%s2267_s16 + $0x498] sm:$0xff] %v875_v41  ;;  %v907_v41 = vmul.f32 1.5, %v319_v36  ;;  %v351_v36 = vld [vmem:[%s2254_s23 + $0x698] sm:$0xff] }
  0xc1   : > { %1464 = vst [vmem:[%s2267_s16 + $0x4a0] sm:$0xff] %v876_v43  ;;  %v908_v43 = vmul.f32 1.5, %v320_v38  ;;  %v352_v38 = vld [vmem:[%s2254_s23 + $0x6a0] sm:$0xff] }
  0xc2   : > { %1465 = vst [vmem:[%s2267_s16 + $0x4a8] sm:$0xff] %v877_v45  ;;  %v909_v45 = vmul.f32 1.5, %v321_v40  ;;  %v353_v40 = vld [vmem:[%s2254_s23 + $0x6a8] sm:$0xff] }
  0xc3   : > { %1466 = vst [vmem:[%s2267_s16 + $0x4b0] sm:$0xff] %v878_v47  ;;  %v910_v47 = vmul.f32 1.5, %v322_v42  ;;  %v354_v42 = vld [vmem:[%s2254_s23 + $0x6b0] sm:$0xff] }
  0xc4   : > { %1467 = vst [vmem:[%s2267_s16 + $0x4b8] sm:$0xff] %v879_v49  ;;  %v911_v49 = vmul.f32 1.5, %v323_v44  ;;  %v355_v44 = vld [vmem:[%s2254_s23 + $0x6b8] sm:$0xff] }
  0xc5   : > { %1468 = vst [vmem:[%s2267_s16 + $0x4c0] sm:$0xff] %v880_v51  ;;  %v912_v51 = vmul.f32 1.5, %v324_v46  ;;  %v356_v46 = vld [vmem:[%s2254_s23 + $0x6c0] sm:$0xff] }
  0xc6   : > { %1469 = vst [vmem:[%s2267_s16 + $0x4c8] sm:$0xff] %v881_v53  ;;  %v913_v53 = vmul.f32 1.5, %v325_v48  ;;  %v357_v48 = vld [vmem:[%s2254_s23 + $0x6c8] sm:$0xff] }
  0xc7   : > { %1470 = vst [vmem:[%s2267_s16 + $0x4d0] sm:$0xff] %v882_v55  ;;  %v914_v55 = vmul.f32 1.5, %v326_v50  ;;  %v358_v50 = vld [vmem:[%s2254_s23 + $0x6d0] sm:$0xff] }
  0xc8   : > { %1471 = vst [vmem:[%s2267_s16 + $0x4d8] sm:$0xff] %v883_v57  ;;  %v915_v57 = vmul.f32 1.5, %v327_v52  ;;  %v359_v52 = vld [vmem:[%s2254_s23 + $0x6d8] sm:$0xff] }
  0xc9   : > { %1472 = vst [vmem:[%s2267_s16 + $0x4e0] sm:$0xff] %v884_v59  ;;  %v916_v59 = vmul.f32 1.5, %v328_v54  ;;  %v360_v54 = vld [vmem:[%s2254_s23 + $0x6e0] sm:$0xff] }
  0xca   : > { %1473 = vst [vmem:[%s2267_s16 + $0x4e8] sm:$0xff] %v885_v61  ;;  %v917_v61 = vmul.f32 1.5, %v329_v56  ;;  %v361_v56 = vld [vmem:[%s2254_s23 + $0x6e8] sm:$0xff] }
  0xcb   : > { %1474 = vst [vmem:[%s2267_s16 + $0x4f0] sm:$0xff] %v886_v63  ;;  %v918_v63 = vmul.f32 1.5, %v330_v58  ;;  %v362_v58 = vld [vmem:[%s2254_s23 + $0x6f0] sm:$0xff] }
  0xcc   : > { %1475 = vst [vmem:[%s2267_s16 + $0x4f8] sm:$0xff] %v887_v1  ;;  %v919_v1 = vmul.f32 1.5, %v331_v60  ;;  %v363_v60 = vld [vmem:[%s2254_s23 + $0x6f8] sm:$0xff] }
  0xcd   : > { %1476 = vst [vmem:[%s2267_s16 + $0x500] sm:$0xff] %v888_v3  ;;  %v920_v3 = vmul.f32 1.5, %v332_v62  ;;  %v364_v62 = vld [vmem:[%s2254_s23 + $0x700] sm:$0xff] }
  0xce   : > { %1477 = vst [vmem:[%s2267_s16 + $0x508] sm:$0xff] %v889_v5  ;;  %v921_v5 = vmul.f32 1.5, %v333_v0  ;;  %v365_v0 = vld [vmem:[%s2254_s23 + $0x708] sm:$0xff] }
  0xcf   : > { %1478 = vst [vmem:[%s2267_s16 + $0x510] sm:$0xff] %v890_v7  ;;  %v922_v7 = vmul.f32 1.5, %v334_v2  ;;  %v366_v2 = vld [vmem:[%s2254_s23 + $0x710] sm:$0xff] }
  0xd0   : > { %1479 = vst [vmem:[%s2267_s16 + $0x518] sm:$0xff] %v891_v9  ;;  %v923_v9 = vmul.f32 1.5, %v335_v4  ;;  %v367_v4 = vld [vmem:[%s2254_s23 + $0x718] sm:$0xff] }
  0xd1   : > { %1480 = vst [vmem:[%s2267_s16 + $0x520] sm:$0xff] %v892_v11  ;;  %v924_v11 = vmul.f32 1.5, %v336_v6  ;;  %v368_v6 = vld [vmem:[%s2254_s23 + $0x720] sm:$0xff] }
  0xd2   : > { %1481 = vst [vmem:[%s2267_s16 + $0x528] sm:$0xff] %v893_v13  ;;  %v925_v13 = vmul.f32 1.5, %v337_v8  ;;  %v369_v8 = vld [vmem:[%s2254_s23 + $0x728] sm:$0xff] }
  0xd3   : > { %1482 = vst [vmem:[%s2267_s16 + $0x530] sm:$0xff] %v894_v15  ;;  %v926_v15 = vmul.f32 1.5, %v338_v10  ;;  %v370_v10 = vld [vmem:[%s2254_s23 + $0x730] sm:$0xff] }
  0xd4   : > { %1483 = vst [vmem:[%s2267_s16 + $0x538] sm:$0xff] %v895_v17  ;;  %v927_v17 = vmul.f32 1.5, %v339_v12  ;;  %v371_v12 = vld [vmem:[%s2254_s23 + $0x738] sm:$0xff] }
  0xd5   : > { %1484 = vst [vmem:[%s2267_s16 + $0x540] sm:$0xff] %v896_v19  ;;  %v928_v19 = vmul.f32 1.5, %v340_v14  ;;  %v372_v14 = vld [vmem:[%s2254_s23 + $0x740] sm:$0xff] }
  0xd6   : > { %1485 = vst [vmem:[%s2267_s16 + $0x548] sm:$0xff] %v897_v21  ;;  %v929_v21 = vmul.f32 1.5, %v341_v16  ;;  %v373_v16 = vld [vmem:[%s2254_s23 + $0x748] sm:$0xff] }
  0xd7   : > { %1486 = vst [vmem:[%s2267_s16 + $0x550] sm:$0xff] %v898_v23  ;;  %v930_v23 = vmul.f32 1.5, %v342_v18  ;;  %v374_v18 = vld [vmem:[%s2254_s23 + $0x750] sm:$0xff] }
  0xd8   : > { %1487 = vst [vmem:[%s2267_s16 + $0x558] sm:$0xff] %v899_v25  ;;  %v931_v25 = vmul.f32 1.5, %v343_v20  ;;  %v375_v20 = vld [vmem:[%s2254_s23 + $0x758] sm:$0xff] }
  0xd9   : > { %1488 = vst [vmem:[%s2267_s16 + $0x560] sm:$0xff] %v900_v27  ;;  %v932_v27 = vmul.f32 1.5, %v344_v22  ;;  %v376_v22 = vld [vmem:[%s2254_s23 + $0x760] sm:$0xff] }
  0xda   : > { %1489 = vst [vmem:[%s2267_s16 + $0x568] sm:$0xff] %v901_v29  ;;  %v933_v29 = vmul.f32 1.5, %v345_v24  ;;  %v377_v24 = vld [vmem:[%s2254_s23 + $0x768] sm:$0xff] }
  0xdb   : > { %1490 = vst [vmem:[%s2267_s16 + $0x570] sm:$0xff] %v902_v31  ;;  %v934_v31 = vmul.f32 1.5, %v346_v26  ;;  %v378_v26 = vld [vmem:[%s2254_s23 + $0x770] sm:$0xff] }
  0xdc   : > { %1491 = vst [vmem:[%s2267_s16 + $0x578] sm:$0xff] %v903_v33  ;;  %v935_v33 = vmul.f32 1.5, %v347_v28  ;;  %v379_v28 = vld [vmem:[%s2254_s23 + $0x778] sm:$0xff] }
  0xdd   : > { %1492 = vst [vmem:[%s2267_s16 + $0x580] sm:$0xff] %v904_v35  ;;  %v936_v35 = vmul.f32 1.5, %v348_v30  ;;  %v380_v30 = vld [vmem:[%s2254_s23 + $0x780] sm:$0xff] }
  0xde   : > { %1493 = vst [vmem:[%s2267_s16 + $0x588] sm:$0xff] %v905_v37  ;;  %v937_v37 = vmul.f32 1.5, %v349_v32  ;;  %v381_v32 = vld [vmem:[%s2254_s23 + $0x788] sm:$0xff] }
  0xdf   : > { %1494 = vst [vmem:[%s2267_s16 + $0x590] sm:$0xff] %v906_v39  ;;  %v938_v39 = vmul.f32 1.5, %v350_v34  ;;  %v382_v34 = vld [vmem:[%s2254_s23 + $0x790] sm:$0xff] }
  0xe0   : > { %1495 = vst [vmem:[%s2267_s16 + $0x598] sm:$0xff] %v907_v41  ;;  %v939_v41 = vmul.f32 1.5, %v351_v36  ;;  %v383_v36 = vld [vmem:[%s2254_s23 + $0x798] sm:$0xff] }
  0xe1   : > { %1496 = vst [vmem:[%s2267_s16 + $0x5a0] sm:$0xff] %v908_v43  ;;  %v940_v43 = vmul.f32 1.5, %v352_v38  ;;  %v384_v38 = vld [vmem:[%s2254_s23 + $0x7a0] sm:$0xff] }
  0xe2   : > { %1497 = vst [vmem:[%s2267_s16 + $0x5a8] sm:$0xff] %v909_v45  ;;  %v941_v45 = vmul.f32 1.5, %v353_v40  ;;  %v385_v40 = vld [vmem:[%s2254_s23 + $0x7a8] sm:$0xff] }
  0xe3   : > { %1498 = vst [vmem:[%s2267_s16 + $0x5b0] sm:$0xff] %v910_v47  ;;  %v942_v47 = vmul.f32 1.5, %v354_v42  ;;  %v386_v42 = vld [vmem:[%s2254_s23 + $0x7b0] sm:$0xff] }
  0xe4   : > { %1499 = vst [vmem:[%s2267_s16 + $0x5b8] sm:$0xff] %v911_v49  ;;  %v943_v49 = vmul.f32 1.5, %v355_v44  ;;  %v387_v44 = vld [vmem:[%s2254_s23 + $0x7b8] sm:$0xff] }
  0xe5   : > { %1500 = vst [vmem:[%s2267_s16 + $0x5c0] sm:$0xff] %v912_v51  ;;  %v944_v51 = vmul.f32 1.5, %v356_v46  ;;  %v388_v46 = vld [vmem:[%s2254_s23 + $0x7c0] sm:$0xff] }
  0xe6   : > { %1501 = vst [vmem:[%s2267_s16 + $0x5c8] sm:$0xff] %v913_v53  ;;  %v945_v53 = vmul.f32 1.5, %v357_v48  ;;  %v389_v48 = vld [vmem:[%s2254_s23 + $0x7c8] sm:$0xff] }
  0xe7   : > { %1502 = vst [vmem:[%s2267_s16 + $0x5d0] sm:$0xff] %v914_v55  ;;  %v946_v55 = vmul.f32 1.5, %v358_v50  ;;  %v390_v50 = vld [vmem:[%s2254_s23 + $0x7d0] sm:$0xff] }
  0xe8   : > { %1503 = vst [vmem:[%s2267_s16 + $0x5d8] sm:$0xff] %v915_v57  ;;  %v947_v57 = vmul.f32 1.5, %v359_v52  ;;  %v391_v52 = vld [vmem:[%s2254_s23 + $0x7d8] sm:$0xff] }
  0xe9   : > { %1504 = vst [vmem:[%s2267_s16 + $0x5e0] sm:$0xff] %v916_v59  ;;  %v948_v59 = vmul.f32 1.5, %v360_v54  ;;  %v392_v54 = vld [vmem:[%s2254_s23 + $0x7e0] sm:$0xff] }
  0xea   : > { %1505 = vst [vmem:[%s2267_s16 + $0x5e8] sm:$0xff] %v917_v61  ;;  %v949_v61 = vmul.f32 1.5, %v361_v56  ;;  %v393_v56 = vld [vmem:[%s2254_s23 + $0x7e8] sm:$0xff] }
  0xeb   : > { %1506 = vst [vmem:[%s2267_s16 + $0x5f0] sm:$0xff] %v918_v63  ;;  %v950_v63 = vmul.f32 1.5, %v362_v58  ;;  %v394_v58 = vld [vmem:[%s2254_s23 + $0x7f0] sm:$0xff] }
  0xec   : > { %1507 = vst [vmem:[%s2267_s16 + $0x5f8] sm:$0xff] %v919_v1  ;;  %v951_v1 = vmul.f32 1.5, %v363_v60  ;;  %v395_v60 = vld [vmem:[%s2254_s23 + $0x7f8] sm:$0xff] }
  0xed   : > { %1508 = vst [vmem:[%s2267_s16 + $0x600] sm:$0xff] %v920_v3  ;;  %v952_v3 = vmul.f32 1.5, %v364_v62  ;;  %v396_v62 = vld [vmem:[%s2254_s23 + $0x800] sm:$0xff] }
  0xee   : > { %1509 = vst [vmem:[%s2267_s16 + $0x608] sm:$0xff] %v921_v5  ;;  %v953_v5 = vmul.f32 1.5, %v365_v0  ;;  %v397_v0 = vld [vmem:[%s2254_s23 + $0x808] sm:$0xff] }
  0xef   : > { %1510 = vst [vmem:[%s2267_s16 + $0x610] sm:$0xff] %v922_v7  ;;  %v954_v7 = vmul.f32 1.5, %v366_v2  ;;  %v398_v2 = vld [vmem:[%s2254_s23 + $0x810] sm:$0xff] }
  0xf0   : > { %1511 = vst [vmem:[%s2267_s16 + $0x618] sm:$0xff] %v923_v9  ;;  %v955_v9 = vmul.f32 1.5, %v367_v4  ;;  %v399_v4 = vld [vmem:[%s2254_s23 + $0x818] sm:$0xff] }
  0xf1   : > { %1512 = vst [vmem:[%s2267_s16 + $0x620] sm:$0xff] %v924_v11  ;;  %v956_v11 = vmul.f32 1.5, %v368_v6  ;;  %v400_v6 = vld [vmem:[%s2254_s23 + $0x820] sm:$0xff] }
  0xf2   : > { %1513 = vst [vmem:[%s2267_s16 + $0x628] sm:$0xff] %v925_v13  ;;  %v957_v13 = vmul.f32 1.5, %v369_v8  ;;  %v401_v8 = vld [vmem:[%s2254_s23 + $0x828] sm:$0xff] }
  0xf3   : > { %1514 = vst [vmem:[%s2267_s16 + $0x630] sm:$0xff] %v926_v15  ;;  %v958_v15 = vmul.f32 1.5, %v370_v10  ;;  %v402_v10 = vld [vmem:[%s2254_s23 + $0x830] sm:$0xff] }
  0xf4   : > { %1515 = vst [vmem:[%s2267_s16 + $0x638] sm:$0xff] %v927_v17  ;;  %v959_v17 = vmul.f32 1.5, %v371_v12  ;;  %v403_v12 = vld [vmem:[%s2254_s23 + $0x838] sm:$0xff] }
  0xf5   : > { %1516 = vst [vmem:[%s2267_s16 + $0x640] sm:$0xff] %v928_v19  ;;  %v960_v19 = vmul.f32 1.5, %v372_v14  ;;  %v404_v14 = vld [vmem:[%s2254_s23 + $0x840] sm:$0xff] }
  0xf6   : > { %1517 = vst [vmem:[%s2267_s16 + $0x648] sm:$0xff] %v929_v21  ;;  %v961_v21 = vmul.f32 1.5, %v373_v16  ;;  %v405_v16 = vld [vmem:[%s2254_s23 + $0x848] sm:$0xff] }
  0xf7   : > { %1518 = vst [vmem:[%s2267_s16 + $0x650] sm:$0xff] %v930_v23  ;;  %v962_v23 = vmul.f32 1.5, %v374_v18  ;;  %v406_v18 = vld [vmem:[%s2254_s23 + $0x850] sm:$0xff] }
  0xf8   : > { %1519 = vst [vmem:[%s2267_s16 + $0x658] sm:$0xff] %v931_v25  ;;  %v963_v25 = vmul.f32 1.5, %v375_v20  ;;  %v407_v20 = vld [vmem:[%s2254_s23 + $0x858] sm:$0xff] }
  0xf9   : > { %1520 = vst [vmem:[%s2267_s16 + $0x660] sm:$0xff] %v932_v27  ;;  %v964_v27 = vmul.f32 1.5, %v376_v22  ;;  %v408_v22 = vld [vmem:[%s2254_s23 + $0x860] sm:$0xff] }
  0xfa   : > { %1521 = vst [vmem:[%s2267_s16 + $0x668] sm:$0xff] %v933_v29  ;;  %v965_v29 = vmul.f32 1.5, %v377_v24  ;;  %v409_v24 = vld [vmem:[%s2254_s23 + $0x868] sm:$0xff] }
  0xfb   : > { %1522 = vst [vmem:[%s2267_s16 + $0x670] sm:$0xff] %v934_v31  ;;  %v966_v31 = vmul.f32 1.5, %v378_v26  ;;  %v410_v26 = vld [vmem:[%s2254_s23 + $0x870] sm:$0xff] }
  0xfc   : > { %1523 = vst [vmem:[%s2267_s16 + $0x678] sm:$0xff] %v935_v33  ;;  %v967_v33 = vmul.f32 1.5, %v379_v28  ;;  %v411_v28 = vld [vmem:[%s2254_s23 + $0x878] sm:$0xff] }
  0xfd   : > { %1524 = vst [vmem:[%s2267_s16 + $0x680] sm:$0xff] %v936_v35  ;;  %v968_v35 = vmul.f32 1.5, %v380_v30  ;;  %v412_v30 = vld [vmem:[%s2254_s23 + $0x880] sm:$0xff] }
  0xfe   : > { %1525 = vst [vmem:[%s2267_s16 + $0x688] sm:$0xff] %v937_v37  ;;  %v969_v37 = vmul.f32 1.5, %v381_v32  ;;  %v413_v32 = vld [vmem:[%s2254_s23 + $0x888] sm:$0xff] }
  0xff   : > { %1526 = vst [vmem:[%s2267_s16 + $0x690] sm:$0xff] %v938_v39  ;;  %v970_v39 = vmul.f32 1.5, %v382_v34  ;;  %v414_v34 = vld [vmem:[%s2254_s23 + $0x890] sm:$0xff] }
 0x100   : > { %1527 = vst [vmem:[%s2267_s16 + $0x698] sm:$0xff] %v939_v41  ;;  %v971_v41 = vmul.f32 1.5, %v383_v36  ;;  %v415_v36 = vld [vmem:[%s2254_s23 + $0x898] sm:$0xff] }
 0x101   : > { %1528 = vst [vmem:[%s2267_s16 + $0x6a0] sm:$0xff] %v940_v43  ;;  %v972_v43 = vmul.f32 1.5, %v384_v38  ;;  %v416_v38 = vld [vmem:[%s2254_s23 + $0x8a0] sm:$0xff] }
 0x102   : > { %1529 = vst [vmem:[%s2267_s16 + $0x6a8] sm:$0xff] %v941_v45  ;;  %v973_v45 = vmul.f32 1.5, %v385_v40  ;;  %v417_v40 = vld [vmem:[%s2254_s23 + $0x8a8] sm:$0xff] }
 0x103   : > { %1530 = vst [vmem:[%s2267_s16 + $0x6b0] sm:$0xff] %v942_v47  ;;  %v974_v47 = vmul.f32 1.5, %v386_v42  ;;  %v418_v42 = vld [vmem:[%s2254_s23 + $0x8b0] sm:$0xff] }
 0x104   : > { %1531 = vst [vmem:[%s2267_s16 + $0x6b8] sm:$0xff] %v943_v49  ;;  %v975_v49 = vmul.f32 1.5, %v387_v44  ;;  %v419_v44 = vld [vmem:[%s2254_s23 + $0x8b8] sm:$0xff] }
 0x105   : > { %1532 = vst [vmem:[%s2267_s16 + $0x6c0] sm:$0xff] %v944_v51  ;;  %v976_v51 = vmul.f32 1.5, %v388_v46  ;;  %v420_v46 = vld [vmem:[%s2254_s23 + $0x8c0] sm:$0xff] }
 0x106   : > { %1533 = vst [vmem:[%s2267_s16 + $0x6c8] sm:$0xff] %v945_v53  ;;  %v977_v53 = vmul.f32 1.5, %v389_v48  ;;  %v421_v48 = vld [vmem:[%s2254_s23 + $0x8c8] sm:$0xff] }
 0x107   : > { %1534 = vst [vmem:[%s2267_s16 + $0x6d0] sm:$0xff] %v946_v55  ;;  %v978_v55 = vmul.f32 1.5, %v390_v50  ;;  %v422_v50 = vld [vmem:[%s2254_s23 + $0x8d0] sm:$0xff] }
 0x108   : > { %1535 = vst [vmem:[%s2267_s16 + $0x6d8] sm:$0xff] %v947_v57  ;;  %v979_v57 = vmul.f32 1.5, %v391_v52  ;;  %v423_v52 = vld [vmem:[%s2254_s23 + $0x8d8] sm:$0xff] }
 0x109   : > { %1536 = vst [vmem:[%s2267_s16 + $0x6e0] sm:$0xff] %v948_v59  ;;  %v980_v59 = vmul.f32 1.5, %v392_v54  ;;  %v424_v54 = vld [vmem:[%s2254_s23 + $0x8e0] sm:$0xff] }
 0x10a   : > { %1537 = vst [vmem:[%s2267_s16 + $0x6e8] sm:$0xff] %v949_v61  ;;  %v981_v61 = vmul.f32 1.5, %v393_v56  ;;  %v425_v56 = vld [vmem:[%s2254_s23 + $0x8e8] sm:$0xff] }
 0x10b   : > { %1538 = vst [vmem:[%s2267_s16 + $0x6f0] sm:$0xff] %v950_v63  ;;  %v982_v63 = vmul.f32 1.5, %v394_v58  ;;  %v426_v58 = vld [vmem:[%s2254_s23 + $0x8f0] sm:$0xff] }
 0x10c   : > { %1539 = vst [vmem:[%s2267_s16 + $0x6f8] sm:$0xff] %v951_v1  ;;  %v983_v1 = vmul.f32 1.5, %v395_v60  ;;  %v427_v60 = vld [vmem:[%s2254_s23 + $0x8f8] sm:$0xff] }
 0x10d   : > { %1540 = vst [vmem:[%s2267_s16 + $0x700] sm:$0xff] %v952_v3  ;;  %v984_v3 = vmul.f32 1.5, %v396_v62  ;;  %v428_v62 = vld [vmem:[%s2254_s23 + $0x900] sm:$0xff] }
 0x10e   : > { %1541 = vst [vmem:[%s2267_s16 + $0x708] sm:$0xff] %v953_v5  ;;  %v985_v5 = vmul.f32 1.5, %v397_v0  ;;  %v429_v0 = vld [vmem:[%s2254_s23 + $0x908] sm:$0xff] }
 0x10f   : > { %1542 = vst [vmem:[%s2267_s16 + $0x710] sm:$0xff] %v954_v7  ;;  %v986_v7 = vmul.f32 1.5, %v398_v2  ;;  %v430_v2 = vld [vmem:[%s2254_s23 + $0x910] sm:$0xff] }
 0x110   : > { %1543 = vst [vmem:[%s2267_s16 + $0x718] sm:$0xff] %v955_v9  ;;  %v987_v9 = vmul.f32 1.5, %v399_v4  ;;  %v431_v4 = vld [vmem:[%s2254_s23 + $0x918] sm:$0xff] }
 0x111   : > { %1544 = vst [vmem:[%s2267_s16 + $0x720] sm:$0xff] %v956_v11  ;;  %v988_v11 = vmul.f32 1.5, %v400_v6  ;;  %v432_v6 = vld [vmem:[%s2254_s23 + $0x920] sm:$0xff] }
 0x112   : > { %1545 = vst [vmem:[%s2267_s16 + $0x728] sm:$0xff] %v957_v13  ;;  %v989_v13 = vmul.f32 1.5, %v401_v8  ;;  %v433_v8 = vld [vmem:[%s2254_s23 + $0x928] sm:$0xff] }
 0x113   : > { %1546 = vst [vmem:[%s2267_s16 + $0x730] sm:$0xff] %v958_v15  ;;  %v990_v15 = vmul.f32 1.5, %v402_v10  ;;  %v434_v10 = vld [vmem:[%s2254_s23 + $0x930] sm:$0xff] }
 0x114   : > { %1547 = vst [vmem:[%s2267_s16 + $0x738] sm:$0xff] %v959_v17  ;;  %v991_v17 = vmul.f32 1.5, %v403_v12  ;;  %v435_v12 = vld [vmem:[%s2254_s23 + $0x938] sm:$0xff] }
 0x115   : > { %1548 = vst [vmem:[%s2267_s16 + $0x740] sm:$0xff] %v960_v19  ;;  %v992_v19 = vmul.f32 1.5, %v404_v14  ;;  %v436_v14 = vld [vmem:[%s2254_s23 + $0x940] sm:$0xff] }
 0x116   : > { %1549 = vst [vmem:[%s2267_s16 + $0x748] sm:$0xff] %v961_v21  ;;  %v993_v21 = vmul.f32 1.5, %v405_v16  ;;  %v437_v16 = vld [vmem:[%s2254_s23 + $0x948] sm:$0xff] }
 0x117   : > { %1550 = vst [vmem:[%s2267_s16 + $0x750] sm:$0xff] %v962_v23  ;;  %v994_v23 = vmul.f32 1.5, %v406_v18  ;;  %v438_v18 = vld [vmem:[%s2254_s23 + $0x950] sm:$0xff] }
 0x118   : > { %1551 = vst [vmem:[%s2267_s16 + $0x758] sm:$0xff] %v963_v25  ;;  %v995_v25 = vmul.f32 1.5, %v407_v20  ;;  %v439_v20 = vld [vmem:[%s2254_s23 + $0x958] sm:$0xff] }
 0x119   : > { %1552 = vst [vmem:[%s2267_s16 + $0x760] sm:$0xff] %v964_v27  ;;  %v996_v27 = vmul.f32 1.5, %v408_v22  ;;  %v440_v22 = vld [vmem:[%s2254_s23 + $0x960] sm:$0xff] }
 0x11a   : > { %1553 = vst [vmem:[%s2267_s16 + $0x768] sm:$0xff] %v965_v29  ;;  %v997_v29 = vmul.f32 1.5, %v409_v24  ;;  %v441_v24 = vld [vmem:[%s2254_s23 + $0x968] sm:$0xff] }
 0x11b   : > { %1554 = vst [vmem:[%s2267_s16 + $0x770] sm:$0xff] %v966_v31  ;;  %v998_v31 = vmul.f32 1.5, %v410_v26  ;;  %v442_v26 = vld [vmem:[%s2254_s23 + $0x970] sm:$0xff] }
 0x11c   : > { %1555 = vst [vmem:[%s2267_s16 + $0x778] sm:$0xff] %v967_v33  ;;  %v999_v33 = vmul.f32 1.5, %v411_v28  ;;  %v443_v28 = vld [vmem:[%s2254_s23 + $0x978] sm:$0xff] }
 0x11d   : > { %1556 = vst [vmem:[%s2267_s16 + $0x780] sm:$0xff] %v968_v35  ;;  %v1000_v35 = vmul.f32 1.5, %v412_v30  ;;  %v444_v30 = vld [vmem:[%s2254_s23 + $0x980] sm:$0xff] }
 0x11e   : > { %1557 = vst [vmem:[%s2267_s16 + $0x788] sm:$0xff] %v969_v37  ;;  %v1001_v37 = vmul.f32 1.5, %v413_v32  ;;  %v445_v32 = vld [vmem:[%s2254_s23 + $0x988] sm:$0xff] }
 0x11f   : > { %1558 = vst [vmem:[%s2267_s16 + $0x790] sm:$0xff] %v970_v39  ;;  %v1002_v39 = vmul.f32 1.5, %v414_v34  ;;  %v446_v34 = vld [vmem:[%s2254_s23 + $0x990] sm:$0xff] }
 0x120   : > { %1559 = vst [vmem:[%s2267_s16 + $0x798] sm:$0xff] %v971_v41  ;;  %v1003_v41 = vmul.f32 1.5, %v415_v36  ;;  %v447_v36 = vld [vmem:[%s2254_s23 + $0x998] sm:$0xff] }
 0x121   : > { %1560 = vst [vmem:[%s2267_s16 + $0x7a0] sm:$0xff] %v972_v43  ;;  %v1004_v43 = vmul.f32 1.5, %v416_v38  ;;  %v448_v38 = vld [vmem:[%s2254_s23 + $0x9a0] sm:$0xff] }
 0x122   : > { %1561 = vst [vmem:[%s2267_s16 + $0x7a8] sm:$0xff] %v973_v45  ;;  %v1005_v45 = vmul.f32 1.5, %v417_v40  ;;  %v449_v40 = vld [vmem:[%s2254_s23 + $0x9a8] sm:$0xff] }
 0x123   : > { %1562 = vst [vmem:[%s2267_s16 + $0x7b0] sm:$0xff] %v974_v47  ;;  %v1006_v47 = vmul.f32 1.5, %v418_v42  ;;  %v450_v42 = vld [vmem:[%s2254_s23 + $0x9b0] sm:$0xff] }
 0x124   : > { %1563 = vst [vmem:[%s2267_s16 + $0x7b8] sm:$0xff] %v975_v49  ;;  %v1007_v49 = vmul.f32 1.5, %v419_v44  ;;  %v451_v44 = vld [vmem:[%s2254_s23 + $0x9b8] sm:$0xff] }
 0x125   : > { %1564 = vst [vmem:[%s2267_s16 + $0x7c0] sm:$0xff] %v976_v51  ;;  %v1008_v51 = vmul.f32 1.5, %v420_v46  ;;  %v452_v46 = vld [vmem:[%s2254_s23 + $0x9c0] sm:$0xff] }
 0x126   : > { %1565 = vst [vmem:[%s2267_s16 + $0x7c8] sm:$0xff] %v977_v53  ;;  %v1009_v53 = vmul.f32 1.5, %v421_v48  ;;  %v453_v48 = vld [vmem:[%s2254_s23 + $0x9c8] sm:$0xff] }
 0x127   : > { %1566 = vst [vmem:[%s2267_s16 + $0x7d0] sm:$0xff] %v978_v55  ;;  %v1010_v55 = vmul.f32 1.5, %v422_v50  ;;  %v454_v50 = vld [vmem:[%s2254_s23 + $0x9d0] sm:$0xff] }
 0x128   : > { %1567 = vst [vmem:[%s2267_s16 + $0x7d8] sm:$0xff] %v979_v57  ;;  %v1011_v57 = vmul.f32 1.5, %v423_v52  ;;  %v455_v52 = vld [vmem:[%s2254_s23 + $0x9d8] sm:$0xff] }
 0x129   : > { %1568 = vst [vmem:[%s2267_s16 + $0x7e0] sm:$0xff] %v980_v59  ;;  %v1012_v59 = vmul.f32 1.5, %v424_v54  ;;  %v456_v54 = vld [vmem:[%s2254_s23 + $0x9e0] sm:$0xff] }
 0x12a   : > { %1569 = vst [vmem:[%s2267_s16 + $0x7e8] sm:$0xff] %v981_v61  ;;  %v1013_v61 = vmul.f32 1.5, %v425_v56  ;;  %v457_v56 = vld [vmem:[%s2254_s23 + $0x9e8] sm:$0xff] }
 0x12b   : > { %1570 = vst [vmem:[%s2267_s16 + $0x7f0] sm:$0xff] %v982_v63  ;;  %v1014_v63 = vmul.f32 1.5, %v426_v58  ;;  %v458_v58 = vld [vmem:[%s2254_s23 + $0x9f0] sm:$0xff] }
 0x12c   : > { %1571 = vst [vmem:[%s2267_s16 + $0x7f8] sm:$0xff] %v983_v1  ;;  %v1015_v1 = vmul.f32 1.5, %v427_v60  ;;  %v459_v60 = vld [vmem:[%s2254_s23 + $0x9f8] sm:$0xff] }
 0x12d   : > { %1572 = vst [vmem:[%s2267_s16 + $0x800] sm:$0xff] %v984_v3  ;;  %v1016_v3 = vmul.f32 1.5, %v428_v62  ;;  %v460_v62 = vld [vmem:[%s2254_s23 + $0xa00] sm:$0xff] }
 0x12e   : > { %1573 = vst [vmem:[%s2267_s16 + $0x808] sm:$0xff] %v985_v5  ;;  %v1017_v5 = vmul.f32 1.5, %v429_v0  ;;  %v461_v0 = vld [vmem:[%s2254_s23 + $0xa08] sm:$0xff] }
 0x12f   : > { %1574 = vst [vmem:[%s2267_s16 + $0x810] sm:$0xff] %v986_v7  ;;  %v1018_v7 = vmul.f32 1.5, %v430_v2  ;;  %v462_v2 = vld [vmem:[%s2254_s23 + $0xa10] sm:$0xff] }
 0x130   : > { %1575 = vst [vmem:[%s2267_s16 + $0x818] sm:$0xff] %v987_v9  ;;  %v1019_v9 = vmul.f32 1.5, %v431_v4  ;;  %v463_v4 = vld [vmem:[%s2254_s23 + $0xa18] sm:$0xff] }
 0x131   : > { %1576 = vst [vmem:[%s2267_s16 + $0x820] sm:$0xff] %v988_v11  ;;  %v1020_v11 = vmul.f32 1.5, %v432_v6  ;;  %v464_v6 = vld [vmem:[%s2254_s23 + $0xa20] sm:$0xff] }
 0x132   : > { %1577 = vst [vmem:[%s2267_s16 + $0x828] sm:$0xff] %v989_v13  ;;  %v1021_v13 = vmul.f32 1.5, %v433_v8  ;;  %v465_v8 = vld [vmem:[%s2254_s23 + $0xa28] sm:$0xff] }
 0x133   : > { %1578 = vst [vmem:[%s2267_s16 + $0x830] sm:$0xff] %v990_v15  ;;  %v1022_v15 = vmul.f32 1.5, %v434_v10  ;;  %v466_v10 = vld [vmem:[%s2254_s23 + $0xa30] sm:$0xff] }
 0x134   : > { %1579 = vst [vmem:[%s2267_s16 + $0x838] sm:$0xff] %v991_v17  ;;  %v1023_v17 = vmul.f32 1.5, %v435_v12  ;;  %v467_v12 = vld [vmem:[%s2254_s23 + $0xa38] sm:$0xff] }
 0x135   : > { %1580 = vst [vmem:[%s2267_s16 + $0x840] sm:$0xff] %v992_v19  ;;  %v1024_v19 = vmul.f32 1.5, %v436_v14  ;;  %v468_v14 = vld [vmem:[%s2254_s23 + $0xa40] sm:$0xff] }
 0x136   : > { %1581 = vst [vmem:[%s2267_s16 + $0x848] sm:$0xff] %v993_v21  ;;  %v1025_v21 = vmul.f32 1.5, %v437_v16  ;;  %v469_v16 = vld [vmem:[%s2254_s23 + $0xa48] sm:$0xff] }
 0x137   : > { %1582 = vst [vmem:[%s2267_s16 + $0x850] sm:$0xff] %v994_v23  ;;  %v1026_v23 = vmul.f32 1.5, %v438_v18  ;;  %v470_v18 = vld [vmem:[%s2254_s23 + $0xa50] sm:$0xff] }
 0x138   : > { %1583 = vst [vmem:[%s2267_s16 + $0x858] sm:$0xff] %v995_v25  ;;  %v1027_v25 = vmul.f32 1.5, %v439_v20  ;;  %v471_v20 = vld [vmem:[%s2254_s23 + $0xa58] sm:$0xff] }
 0x139   : > { %1584 = vst [vmem:[%s2267_s16 + $0x860] sm:$0xff] %v996_v27  ;;  %v1028_v27 = vmul.f32 1.5, %v440_v22  ;;  %v472_v22 = vld [vmem:[%s2254_s23 + $0xa60] sm:$0xff] }
 0x13a   : > { %1585 = vst [vmem:[%s2267_s16 + $0x868] sm:$0xff] %v997_v29  ;;  %v1029_v29 = vmul.f32 1.5, %v441_v24  ;;  %v473_v24 = vld [vmem:[%s2254_s23 + $0xa68] sm:$0xff] }
 0x13b   : > { %1586 = vst [vmem:[%s2267_s16 + $0x870] sm:$0xff] %v998_v31  ;;  %v1030_v31 = vmul.f32 1.5, %v442_v26  ;;  %v474_v26 = vld [vmem:[%s2254_s23 + $0xa70] sm:$0xff] }
 0x13c   : > { %1587 = vst [vmem:[%s2267_s16 + $0x878] sm:$0xff] %v999_v33  ;;  %v1031_v33 = vmul.f32 1.5, %v443_v28  ;;  %v475_v28 = vld [vmem:[%s2254_s23 + $0xa78] sm:$0xff] }
 0x13d   : > { %1588 = vst [vmem:[%s2267_s16 + $0x880] sm:$0xff] %v1000_v35  ;;  %v1032_v35 = vmul.f32 1.5, %v444_v30  ;;  %v476_v30 = vld [vmem:[%s2254_s23 + $0xa80] sm:$0xff] }
 0x13e   : > { %1589 = vst [vmem:[%s2267_s16 + $0x888] sm:$0xff] %v1001_v37  ;;  %v1033_v37 = vmul.f32 1.5, %v445_v32  ;;  %v477_v32 = vld [vmem:[%s2254_s23 + $0xa88] sm:$0xff] }
 0x13f   : > { %1590 = vst [vmem:[%s2267_s16 + $0x890] sm:$0xff] %v1002_v39  ;;  %v1034_v39 = vmul.f32 1.5, %v446_v34  ;;  %v478_v34 = vld [vmem:[%s2254_s23 + $0xa90] sm:$0xff] }
 0x140   : > { %1591 = vst [vmem:[%s2267_s16 + $0x898] sm:$0xff] %v1003_v41  ;;  %v1035_v41 = vmul.f32 1.5, %v447_v36  ;;  %v479_v36 = vld [vmem:[%s2254_s23 + $0xa98] sm:$0xff] }
 0x141   : > { %1592 = vst [vmem:[%s2267_s16 + $0x8a0] sm:$0xff] %v1004_v43  ;;  %v1036_v43 = vmul.f32 1.5, %v448_v38  ;;  %v480_v38 = vld [vmem:[%s2254_s23 + $0xaa0] sm:$0xff] }
 0x142   : > { %1593 = vst [vmem:[%s2267_s16 + $0x8a8] sm:$0xff] %v1005_v45  ;;  %v1037_v45 = vmul.f32 1.5, %v449_v40  ;;  %v481_v40 = vld [vmem:[%s2254_s23 + $0xaa8] sm:$0xff] }
 0x143   : > { %1594 = vst [vmem:[%s2267_s16 + $0x8b0] sm:$0xff] %v1006_v47  ;;  %v1038_v47 = vmul.f32 1.5, %v450_v42  ;;  %v482_v42 = vld [vmem:[%s2254_s23 + $0xab0] sm:$0xff] }
 0x144   : > { %1595 = vst [vmem:[%s2267_s16 + $0x8b8] sm:$0xff] %v1007_v49  ;;  %v1039_v49 = vmul.f32 1.5, %v451_v44  ;;  %v483_v44 = vld [vmem:[%s2254_s23 + $0xab8] sm:$0xff] }
 0x145   : > { %1596 = vst [vmem:[%s2267_s16 + $0x8c0] sm:$0xff] %v1008_v51  ;;  %v1040_v51 = vmul.f32 1.5, %v452_v46  ;;  %v484_v46 = vld [vmem:[%s2254_s23 + $0xac0] sm:$0xff] }
 0x146   : > { %1597 = vst [vmem:[%s2267_s16 + $0x8c8] sm:$0xff] %v1009_v53  ;;  %v1041_v53 = vmul.f32 1.5, %v453_v48  ;;  %v485_v48 = vld [vmem:[%s2254_s23 + $0xac8] sm:$0xff] }
 0x147   : > { %1598 = vst [vmem:[%s2267_s16 + $0x8d0] sm:$0xff] %v1010_v55  ;;  %v1042_v55 = vmul.f32 1.5, %v454_v50  ;;  %v486_v50 = vld [vmem:[%s2254_s23 + $0xad0] sm:$0xff] }
 0x148   : > { %1599 = vst [vmem:[%s2267_s16 + $0x8d8] sm:$0xff] %v1011_v57  ;;  %v1043_v57 = vmul.f32 1.5, %v455_v52  ;;  %v487_v52 = vld [vmem:[%s2254_s23 + $0xad8] sm:$0xff] }
 0x149   : > { %1600 = vst [vmem:[%s2267_s16 + $0x8e0] sm:$0xff] %v1012_v59  ;;  %v1044_v59 = vmul.f32 1.5, %v456_v54  ;;  %v488_v54 = vld [vmem:[%s2254_s23 + $0xae0] sm:$0xff] }
 0x14a   : > { %1601 = vst [vmem:[%s2267_s16 + $0x8e8] sm:$0xff] %v1013_v61  ;;  %v1045_v61 = vmul.f32 1.5, %v457_v56  ;;  %v489_v56 = vld [vmem:[%s2254_s23 + $0xae8] sm:$0xff] }
 0x14b   : > { %1602 = vst [vmem:[%s2267_s16 + $0x8f0] sm:$0xff] %v1014_v63  ;;  %v1046_v63 = vmul.f32 1.5, %v458_v58  ;;  %v490_v58 = vld [vmem:[%s2254_s23 + $0xaf0] sm:$0xff] }
 0x14c   : > { %1603 = vst [vmem:[%s2267_s16 + $0x8f8] sm:$0xff] %v1015_v1  ;;  %v1047_v1 = vmul.f32 1.5, %v459_v60  ;;  %v491_v60 = vld [vmem:[%s2254_s23 + $0xaf8] sm:$0xff] }
 0x14d   : > { %1604 = vst [vmem:[%s2267_s16 + $0x900] sm:$0xff] %v1016_v3  ;;  %v1048_v3 = vmul.f32 1.5, %v460_v62  ;;  %v492_v62 = vld [vmem:[%s2254_s23 + $0xb00] sm:$0xff] }
 0x14e   : > { %1605 = vst [vmem:[%s2267_s16 + $0x908] sm:$0xff] %v1017_v5  ;;  %v1049_v5 = vmul.f32 1.5, %v461_v0  ;;  %v493_v0 = vld [vmem:[%s2254_s23 + $0xb08] sm:$0xff] }
 0x14f   : > { %1606 = vst [vmem:[%s2267_s16 + $0x910] sm:$0xff] %v1018_v7  ;;  %v1050_v7 = vmul.f32 1.5, %v462_v2  ;;  %v494_v2 = vld [vmem:[%s2254_s23 + $0xb10] sm:$0xff] }
 0x150   : > { %1607 = vst [vmem:[%s2267_s16 + $0x918] sm:$0xff] %v1019_v9  ;;  %v1051_v9 = vmul.f32 1.5, %v463_v4  ;;  %v495_v4 = vld [vmem:[%s2254_s23 + $0xb18] sm:$0xff] }
 0x151   : > { %1608 = vst [vmem:[%s2267_s16 + $0x920] sm:$0xff] %v1020_v11  ;;  %v1052_v11 = vmul.f32 1.5, %v464_v6  ;;  %v496_v6 = vld [vmem:[%s2254_s23 + $0xb20] sm:$0xff] }
 0x152   : > { %1609 = vst [vmem:[%s2267_s16 + $0x928] sm:$0xff] %v1021_v13  ;;  %v1053_v13 = vmul.f32 1.5, %v465_v8  ;;  %v497_v8 = vld [vmem:[%s2254_s23 + $0xb28] sm:$0xff] }
 0x153   : > { %1610 = vst [vmem:[%s2267_s16 + $0x930] sm:$0xff] %v1022_v15  ;;  %v1054_v15 = vmul.f32 1.5, %v466_v10  ;;  %v498_v10 = vld [vmem:[%s2254_s23 + $0xb30] sm:$0xff] }
 0x154   : > { %1611 = vst [vmem:[%s2267_s16 + $0x938] sm:$0xff] %v1023_v17  ;;  %v1055_v17 = vmul.f32 1.5, %v467_v12  ;;  %v499_v12 = vld [vmem:[%s2254_s23 + $0xb38] sm:$0xff] }
 0x155   : > { %1612 = vst [vmem:[%s2267_s16 + $0x940] sm:$0xff] %v1024_v19  ;;  %v1056_v19 = vmul.f32 1.5, %v468_v14  ;;  %v500_v14 = vld [vmem:[%s2254_s23 + $0xb40] sm:$0xff] }
 0x156   : > { %1613 = vst [vmem:[%s2267_s16 + $0x948] sm:$0xff] %v1025_v21  ;;  %v1057_v21 = vmul.f32 1.5, %v469_v16  ;;  %v501_v16 = vld [vmem:[%s2254_s23 + $0xb48] sm:$0xff] }
 0x157   : > { %1614 = vst [vmem:[%s2267_s16 + $0x950] sm:$0xff] %v1026_v23  ;;  %v1058_v23 = vmul.f32 1.5, %v470_v18  ;;  %v502_v18 = vld [vmem:[%s2254_s23 + $0xb50] sm:$0xff] }
 0x158   : > { %1615 = vst [vmem:[%s2267_s16 + $0x958] sm:$0xff] %v1027_v25  ;;  %v1059_v25 = vmul.f32 1.5, %v471_v20  ;;  %v503_v20 = vld [vmem:[%s2254_s23 + $0xb58] sm:$0xff] }
 0x159   : > { %1616 = vst [vmem:[%s2267_s16 + $0x960] sm:$0xff] %v1028_v27  ;;  %v1060_v27 = vmul.f32 1.5, %v472_v22  ;;  %v504_v22 = vld [vmem:[%s2254_s23 + $0xb60] sm:$0xff] }
 0x15a   : > { %1617 = vst [vmem:[%s2267_s16 + $0x968] sm:$0xff] %v1029_v29  ;;  %v1061_v29 = vmul.f32 1.5, %v473_v24  ;;  %v505_v24 = vld [vmem:[%s2254_s23 + $0xb68] sm:$0xff] }
 0x15b   : > { %1618 = vst [vmem:[%s2267_s16 + $0x970] sm:$0xff] %v1030_v31  ;;  %v1062_v31 = vmul.f32 1.5, %v474_v26  ;;  %v506_v26 = vld [vmem:[%s2254_s23 + $0xb70] sm:$0xff] }
 0x15c   : > { %1619 = vst [vmem:[%s2267_s16 + $0x978] sm:$0xff] %v1031_v33  ;;  %v1063_v33 = vmul.f32 1.5, %v475_v28  ;;  %v507_v28 = vld [vmem:[%s2254_s23 + $0xb78] sm:$0xff] }
 0x15d   : > { %1620 = vst [vmem:[%s2267_s16 + $0x980] sm:$0xff] %v1032_v35  ;;  %v1064_v35 = vmul.f32 1.5, %v476_v30  ;;  %v508_v30 = vld [vmem:[%s2254_s23 + $0xb80] sm:$0xff] }
 0x15e   : > { %1621 = vst [vmem:[%s2267_s16 + $0x988] sm:$0xff] %v1033_v37  ;;  %v1065_v37 = vmul.f32 1.5, %v477_v32  ;;  %v509_v32 = vld [vmem:[%s2254_s23 + $0xb88] sm:$0xff] }
 0x15f   : > { %1622 = vst [vmem:[%s2267_s16 + $0x990] sm:$0xff] %v1034_v39  ;;  %v1066_v39 = vmul.f32 1.5, %v478_v34  ;;  %v510_v34 = vld [vmem:[%s2254_s23 + $0xb90] sm:$0xff] }
 0x160   : > { %1623 = vst [vmem:[%s2267_s16 + $0x998] sm:$0xff] %v1035_v41  ;;  %v1067_v41 = vmul.f32 1.5, %v479_v36  ;;  %v511_v36 = vld [vmem:[%s2254_s23 + $0xb98] sm:$0xff] }
 0x161   : > { %1624 = vst [vmem:[%s2267_s16 + $0x9a0] sm:$0xff] %v1036_v43  ;;  %v1068_v43 = vmul.f32 1.5, %v480_v38  ;;  %v512_v38 = vld [vmem:[%s2254_s23 + $0xba0] sm:$0xff] }
 0x162   : > { %1625 = vst [vmem:[%s2267_s16 + $0x9a8] sm:$0xff] %v1037_v45  ;;  %v1069_v45 = vmul.f32 1.5, %v481_v40  ;;  %v513_v40 = vld [vmem:[%s2254_s23 + $0xba8] sm:$0xff] }
 0x163   : > { %1626 = vst [vmem:[%s2267_s16 + $0x9b0] sm:$0xff] %v1038_v47  ;;  %v1070_v47 = vmul.f32 1.5, %v482_v42  ;;  %v514_v42 = vld [vmem:[%s2254_s23 + $0xbb0] sm:$0xff] }
 0x164   : > { %1627 = vst [vmem:[%s2267_s16 + $0x9b8] sm:$0xff] %v1039_v49  ;;  %v1071_v49 = vmul.f32 1.5, %v483_v44  ;;  %v515_v44 = vld [vmem:[%s2254_s23 + $0xbb8] sm:$0xff] }
 0x165   : > { %1628 = vst [vmem:[%s2267_s16 + $0x9c0] sm:$0xff] %v1040_v51  ;;  %v1072_v51 = vmul.f32 1.5, %v484_v46  ;;  %v516_v46 = vld [vmem:[%s2254_s23 + $0xbc0] sm:$0xff] }
 0x166   : > { %1629 = vst [vmem:[%s2267_s16 + $0x9c8] sm:$0xff] %v1041_v53  ;;  %v1073_v53 = vmul.f32 1.5, %v485_v48  ;;  %v517_v48 = vld [vmem:[%s2254_s23 + $0xbc8] sm:$0xff] }
 0x167   : > { %1630 = vst [vmem:[%s2267_s16 + $0x9d0] sm:$0xff] %v1042_v55  ;;  %v1074_v55 = vmul.f32 1.5, %v486_v50  ;;  %v518_v50 = vld [vmem:[%s2254_s23 + $0xbd0] sm:$0xff] }
 0x168   : > { %1631 = vst [vmem:[%s2267_s16 + $0x9d8] sm:$0xff] %v1043_v57  ;;  %v1075_v57 = vmul.f32 1.5, %v487_v52  ;;  %v519_v52 = vld [vmem:[%s2254_s23 + $0xbd8] sm:$0xff] }
 0x169   : > { %1632 = vst [vmem:[%s2267_s16 + $0x9e0] sm:$0xff] %v1044_v59  ;;  %v1076_v59 = vmul.f32 1.5, %v488_v54  ;;  %v520_v54 = vld [vmem:[%s2254_s23 + $0xbe0] sm:$0xff] }
 0x16a   : > { %1633 = vst [vmem:[%s2267_s16 + $0x9e8] sm:$0xff] %v1045_v61  ;;  %v1077_v61 = vmul.f32 1.5, %v489_v56  ;;  %v521_v56 = vld [vmem:[%s2254_s23 + $0xbe8] sm:$0xff] }
 0x16b   : > { %1634 = vst [vmem:[%s2267_s16 + $0x9f0] sm:$0xff] %v1046_v63  ;;  %v1078_v63 = vmul.f32 1.5, %v490_v58  ;;  %v522_v58 = vld [vmem:[%s2254_s23 + $0xbf0] sm:$0xff] }
 0x16c   : > { %1635 = vst [vmem:[%s2267_s16 + $0x9f8] sm:$0xff] %v1047_v1  ;;  %v1079_v1 = vmul.f32 1.5, %v491_v60  ;;  %v523_v60 = vld [vmem:[%s2254_s23 + $0xbf8] sm:$0xff] }
 0x16d   : > { %1636 = vst [vmem:[%s2267_s16 + $0xa00] sm:$0xff] %v1048_v3  ;;  %v1080_v3 = vmul.f32 1.5, %v492_v62  ;;  %v524_v62 = vld [vmem:[%s2254_s23 + $0xc00] sm:$0xff] }
 0x16e   : > { %1637 = vst [vmem:[%s2267_s16 + $0xa08] sm:$0xff] %v1049_v5  ;;  %v1081_v5 = vmul.f32 1.5, %v493_v0  ;;  %v525_v0 = vld [vmem:[%s2254_s23 + $0xc08] sm:$0xff] }
 0x16f   : > { %1638 = vst [vmem:[%s2267_s16 + $0xa10] sm:$0xff] %v1050_v7  ;;  %v1082_v7 = vmul.f32 1.5, %v494_v2  ;;  %v526_v2 = vld [vmem:[%s2254_s23 + $0xc10] sm:$0xff] }
 0x170   : > { %1639 = vst [vmem:[%s2267_s16 + $0xa18] sm:$0xff] %v1051_v9  ;;  %v1083_v9 = vmul.f32 1.5, %v495_v4  ;;  %v527_v4 = vld [vmem:[%s2254_s23 + $0xc18] sm:$0xff] }
 0x171   : > { %1640 = vst [vmem:[%s2267_s16 + $0xa20] sm:$0xff] %v1052_v11  ;;  %v1084_v11 = vmul.f32 1.5, %v496_v6  ;;  %v528_v6 = vld [vmem:[%s2254_s23 + $0xc20] sm:$0xff] }
 0x172   : > { %1641 = vst [vmem:[%s2267_s16 + $0xa28] sm:$0xff] %v1053_v13  ;;  %v1085_v13 = vmul.f32 1.5, %v497_v8  ;;  %v529_v8 = vld [vmem:[%s2254_s23 + $0xc28] sm:$0xff] }
 0x173   : > { %1642 = vst [vmem:[%s2267_s16 + $0xa30] sm:$0xff] %v1054_v15  ;;  %v1086_v15 = vmul.f32 1.5, %v498_v10  ;;  %v530_v10 = vld [vmem:[%s2254_s23 + $0xc30] sm:$0xff] }
 0x174   : > { %1643 = vst [vmem:[%s2267_s16 + $0xa38] sm:$0xff] %v1055_v17  ;;  %v1087_v17 = vmul.f32 1.5, %v499_v12  ;;  %v531_v12 = vld [vmem:[%s2254_s23 + $0xc38] sm:$0xff] }
 0x175   : > { %1644 = vst [vmem:[%s2267_s16 + $0xa40] sm:$0xff] %v1056_v19  ;;  %v1088_v19 = vmul.f32 1.5, %v500_v14  ;;  %v532_v14 = vld [vmem:[%s2254_s23 + $0xc40] sm:$0xff] }
 0x176   : > { %1645 = vst [vmem:[%s2267_s16 + $0xa48] sm:$0xff] %v1057_v21  ;;  %v1089_v21 = vmul.f32 1.5, %v501_v16  ;;  %v533_v16 = vld [vmem:[%s2254_s23 + $0xc48] sm:$0xff] }
 0x177   : > { %1646 = vst [vmem:[%s2267_s16 + $0xa50] sm:$0xff] %v1058_v23  ;;  %v1090_v23 = vmul.f32 1.5, %v502_v18  ;;  %v534_v18 = vld [vmem:[%s2254_s23 + $0xc50] sm:$0xff] }
 0x178   : > { %1647 = vst [vmem:[%s2267_s16 + $0xa58] sm:$0xff] %v1059_v25  ;;  %v1091_v25 = vmul.f32 1.5, %v503_v20  ;;  %v535_v20 = vld [vmem:[%s2254_s23 + $0xc58] sm:$0xff] }
 0x179   : > { %1648 = vst [vmem:[%s2267_s16 + $0xa60] sm:$0xff] %v1060_v27  ;;  %v1092_v27 = vmul.f32 1.5, %v504_v22  ;;  %v536_v22 = vld [vmem:[%s2254_s23 + $0xc60] sm:$0xff] }
 0x17a   : > { %1649 = vst [vmem:[%s2267_s16 + $0xa68] sm:$0xff] %v1061_v29  ;;  %v1093_v29 = vmul.f32 1.5, %v505_v24  ;;  %v537_v24 = vld [vmem:[%s2254_s23 + $0xc68] sm:$0xff] }
 0x17b   : > { %1650 = vst [vmem:[%s2267_s16 + $0xa70] sm:$0xff] %v1062_v31  ;;  %v1094_v31 = vmul.f32 1.5, %v506_v26  ;;  %v538_v26 = vld [vmem:[%s2254_s23 + $0xc70] sm:$0xff] }
 0x17c   : > { %1651 = vst [vmem:[%s2267_s16 + $0xa78] sm:$0xff] %v1063_v33  ;;  %v1095_v33 = vmul.f32 1.5, %v507_v28  ;;  %v539_v28 = vld [vmem:[%s2254_s23 + $0xc78] sm:$0xff] }
 0x17d   : > { %1652 = vst [vmem:[%s2267_s16 + $0xa80] sm:$0xff] %v1064_v35  ;;  %v1096_v35 = vmul.f32 1.5, %v508_v30  ;;  %v540_v30 = vld [vmem:[%s2254_s23 + $0xc80] sm:$0xff] }
 0x17e   : > { %1653 = vst [vmem:[%s2267_s16 + $0xa88] sm:$0xff] %v1065_v37  ;;  %v1097_v37 = vmul.f32 1.5, %v509_v32  ;;  %v541_v32 = vld [vmem:[%s2254_s23 + $0xc88] sm:$0xff] }
 0x17f   : > { %1654 = vst [vmem:[%s2267_s16 + $0xa90] sm:$0xff] %v1066_v39  ;;  %v1098_v39 = vmul.f32 1.5, %v510_v34  ;;  %v542_v34 = vld [vmem:[%s2254_s23 + $0xc90] sm:$0xff] }
 0x180   : > { %1655 = vst [vmem:[%s2267_s16 + $0xa98] sm:$0xff] %v1067_v41  ;;  %v1099_v41 = vmul.f32 1.5, %v511_v36  ;;  %v543_v36 = vld [vmem:[%s2254_s23 + $0xc98] sm:$0xff] }
 0x181   : > { %1656 = vst [vmem:[%s2267_s16 + $0xaa0] sm:$0xff] %v1068_v43  ;;  %v1100_v43 = vmul.f32 1.5, %v512_v38  ;;  %v544_v38 = vld [vmem:[%s2254_s23 + $0xca0] sm:$0xff] }
 0x182   : > { %1657 = vst [vmem:[%s2267_s16 + $0xaa8] sm:$0xff] %v1069_v45  ;;  %v1101_v45 = vmul.f32 1.5, %v513_v40  ;;  %v545_v40 = vld [vmem:[%s2254_s23 + $0xca8] sm:$0xff] }
 0x183   : > { %1658 = vst [vmem:[%s2267_s16 + $0xab0] sm:$0xff] %v1070_v47  ;;  %v1102_v47 = vmul.f32 1.5, %v514_v42  ;;  %v546_v42 = vld [vmem:[%s2254_s23 + $0xcb0] sm:$0xff] }
 0x184   : > { %1659 = vst [vmem:[%s2267_s16 + $0xab8] sm:$0xff] %v1071_v49  ;;  %v1103_v49 = vmul.f32 1.5, %v515_v44  ;;  %v547_v44 = vld [vmem:[%s2254_s23 + $0xcb8] sm:$0xff] }
 0x185   : > { %1660 = vst [vmem:[%s2267_s16 + $0xac0] sm:$0xff] %v1072_v51  ;;  %v1104_v51 = vmul.f32 1.5, %v516_v46  ;;  %v548_v46 = vld [vmem:[%s2254_s23 + $0xcc0] sm:$0xff] }
 0x186   : > { %1661 = vst [vmem:[%s2267_s16 + $0xac8] sm:$0xff] %v1073_v53  ;;  %v1105_v53 = vmul.f32 1.5, %v517_v48  ;;  %v549_v48 = vld [vmem:[%s2254_s23 + $0xcc8] sm:$0xff] }
 0x187   : > { %1662 = vst [vmem:[%s2267_s16 + $0xad0] sm:$0xff] %v1074_v55  ;;  %v1106_v55 = vmul.f32 1.5, %v518_v50  ;;  %v550_v50 = vld [vmem:[%s2254_s23 + $0xcd0] sm:$0xff] }
 0x188   : > { %1663 = vst [vmem:[%s2267_s16 + $0xad8] sm:$0xff] %v1075_v57  ;;  %v1107_v57 = vmul.f32 1.5, %v519_v52  ;;  %v551_v52 = vld [vmem:[%s2254_s23 + $0xcd8] sm:$0xff] }
 0x189   : > { %1664 = vst [vmem:[%s2267_s16 + $0xae0] sm:$0xff] %v1076_v59  ;;  %v1108_v59 = vmul.f32 1.5, %v520_v54  ;;  %v552_v54 = vld [vmem:[%s2254_s23 + $0xce0] sm:$0xff] }
 0x18a   : > { %1665 = vst [vmem:[%s2267_s16 + $0xae8] sm:$0xff] %v1077_v61  ;;  %v1109_v61 = vmul.f32 1.5, %v521_v56  ;;  %v553_v56 = vld [vmem:[%s2254_s23 + $0xce8] sm:$0xff] }
 0x18b   : > { %1666 = vst [vmem:[%s2267_s16 + $0xaf0] sm:$0xff] %v1078_v63  ;;  %v1110_v63 = vmul.f32 1.5, %v522_v58  ;;  %v554_v58 = vld [vmem:[%s2254_s23 + $0xcf0] sm:$0xff] }
 0x18c   : > { %1667 = vst [vmem:[%s2267_s16 + $0xaf8] sm:$0xff] %v1079_v1  ;;  %v1111_v1 = vmul.f32 1.5, %v523_v60  ;;  %v555_v60 = vld [vmem:[%s2254_s23 + $0xcf8] sm:$0xff] }
 0x18d   : > { %1668 = vst [vmem:[%s2267_s16 + $0xb00] sm:$0xff] %v1080_v3  ;;  %v1112_v3 = vmul.f32 1.5, %v524_v62  ;;  %v556_v62 = vld [vmem:[%s2254_s23 + $0xd00] sm:$0xff] }
 0x18e   : > { %1669 = vst [vmem:[%s2267_s16 + $0xb08] sm:$0xff] %v1081_v5  ;;  %v1113_v5 = vmul.f32 1.5, %v525_v0  ;;  %v557_v0 = vld [vmem:[%s2254_s23 + $0xd08] sm:$0xff] }
 0x18f   : > { %1670 = vst [vmem:[%s2267_s16 + $0xb10] sm:$0xff] %v1082_v7  ;;  %v1114_v7 = vmul.f32 1.5, %v526_v2  ;;  %v558_v2 = vld [vmem:[%s2254_s23 + $0xd10] sm:$0xff] }
 0x190   : > { %1671 = vst [vmem:[%s2267_s16 + $0xb18] sm:$0xff] %v1083_v9  ;;  %v1115_v9 = vmul.f32 1.5, %v527_v4  ;;  %v559_v4 = vld [vmem:[%s2254_s23 + $0xd18] sm:$0xff] }
 0x191   : > { %1672 = vst [vmem:[%s2267_s16 + $0xb20] sm:$0xff] %v1084_v11  ;;  %v1116_v11 = vmul.f32 1.5, %v528_v6  ;;  %v560_v6 = vld [vmem:[%s2254_s23 + $0xd20] sm:$0xff] }
 0x192   : > { %1673 = vst [vmem:[%s2267_s16 + $0xb28] sm:$0xff] %v1085_v13  ;;  %v1117_v13 = vmul.f32 1.5, %v529_v8  ;;  %v561_v8 = vld [vmem:[%s2254_s23 + $0xd28] sm:$0xff] }
 0x193   : > { %1674 = vst [vmem:[%s2267_s16 + $0xb30] sm:$0xff] %v1086_v15  ;;  %v1118_v15 = vmul.f32 1.5, %v530_v10  ;;  %v562_v10 = vld [vmem:[%s2254_s23 + $0xd30] sm:$0xff] }
 0x194   : > { %1675 = vst [vmem:[%s2267_s16 + $0xb38] sm:$0xff] %v1087_v17  ;;  %v1119_v17 = vmul.f32 1.5, %v531_v12  ;;  %v563_v12 = vld [vmem:[%s2254_s23 + $0xd38] sm:$0xff] }
 0x195   : > { %1676 = vst [vmem:[%s2267_s16 + $0xb40] sm:$0xff] %v1088_v19  ;;  %v1120_v19 = vmul.f32 1.5, %v532_v14  ;;  %v564_v14 = vld [vmem:[%s2254_s23 + $0xd40] sm:$0xff] }
 0x196   : > { %1677 = vst [vmem:[%s2267_s16 + $0xb48] sm:$0xff] %v1089_v21  ;;  %v1121_v21 = vmul.f32 1.5, %v533_v16  ;;  %v565_v16 = vld [vmem:[%s2254_s23 + $0xd48] sm:$0xff] }
 0x197   : > { %1678 = vst [vmem:[%s2267_s16 + $0xb50] sm:$0xff] %v1090_v23  ;;  %v1122_v23 = vmul.f32 1.5, %v534_v18  ;;  %v566_v18 = vld [vmem:[%s2254_s23 + $0xd50] sm:$0xff] }
 0x198   : > { %1679 = vst [vmem:[%s2267_s16 + $0xb58] sm:$0xff] %v1091_v25  ;;  %v1123_v25 = vmul.f32 1.5, %v535_v20  ;;  %v567_v20 = vld [vmem:[%s2254_s23 + $0xd58] sm:$0xff] }
 0x199   : > { %1680 = vst [vmem:[%s2267_s16 + $0xb60] sm:$0xff] %v1092_v27  ;;  %v1124_v27 = vmul.f32 1.5, %v536_v22  ;;  %v568_v22 = vld [vmem:[%s2254_s23 + $0xd60] sm:$0xff] }
 0x19a   : > { %1681 = vst [vmem:[%s2267_s16 + $0xb68] sm:$0xff] %v1093_v29  ;;  %v1125_v29 = vmul.f32 1.5, %v537_v24  ;;  %v569_v24 = vld [vmem:[%s2254_s23 + $0xd68] sm:$0xff] }
 0x19b   : > { %1682 = vst [vmem:[%s2267_s16 + $0xb70] sm:$0xff] %v1094_v31  ;;  %v1126_v31 = vmul.f32 1.5, %v538_v26  ;;  %v570_v26 = vld [vmem:[%s2254_s23 + $0xd70] sm:$0xff] }
 0x19c   : > { %1683 = vst [vmem:[%s2267_s16 + $0xb78] sm:$0xff] %v1095_v33  ;;  %v1127_v33 = vmul.f32 1.5, %v539_v28  ;;  %v571_v28 = vld [vmem:[%s2254_s23 + $0xd78] sm:$0xff] }
 0x19d   : > { %1684 = vst [vmem:[%s2267_s16 + $0xb80] sm:$0xff] %v1096_v35  ;;  %v1128_v35 = vmul.f32 1.5, %v540_v30  ;;  %v572_v30 = vld [vmem:[%s2254_s23 + $0xd80] sm:$0xff] }
 0x19e   : > { %1685 = vst [vmem:[%s2267_s16 + $0xb88] sm:$0xff] %v1097_v37  ;;  %v1129_v37 = vmul.f32 1.5, %v541_v32  ;;  %v573_v32 = vld [vmem:[%s2254_s23 + $0xd88] sm:$0xff] }
 0x19f   : > { %1686 = vst [vmem:[%s2267_s16 + $0xb90] sm:$0xff] %v1098_v39  ;;  %v1130_v39 = vmul.f32 1.5, %v542_v34  ;;  %v574_v34 = vld [vmem:[%s2254_s23 + $0xd90] sm:$0xff] }
 0x1a0   : > { %1687 = vst [vmem:[%s2267_s16 + $0xb98] sm:$0xff] %v1099_v41  ;;  %v1131_v41 = vmul.f32 1.5, %v543_v36  ;;  %v575_v36 = vld [vmem:[%s2254_s23 + $0xd98] sm:$0xff] }
 0x1a1   : > { %1688 = vst [vmem:[%s2267_s16 + $0xba0] sm:$0xff] %v1100_v43  ;;  %v1132_v43 = vmul.f32 1.5, %v544_v38  ;;  %v576_v38 = vld [vmem:[%s2254_s23 + $0xda0] sm:$0xff] }
 0x1a2   : > { %1689 = vst [vmem:[%s2267_s16 + $0xba8] sm:$0xff] %v1101_v45  ;;  %v1133_v45 = vmul.f32 1.5, %v545_v40  ;;  %v577_v40 = vld [vmem:[%s2254_s23 + $0xda8] sm:$0xff] }
 0x1a3   : > { %1690 = vst [vmem:[%s2267_s16 + $0xbb0] sm:$0xff] %v1102_v47  ;;  %v1134_v47 = vmul.f32 1.5, %v546_v42  ;;  %v578_v42 = vld [vmem:[%s2254_s23 + $0xdb0] sm:$0xff] }
 0x1a4   : > { %1691 = vst [vmem:[%s2267_s16 + $0xbb8] sm:$0xff] %v1103_v49  ;;  %v1135_v49 = vmul.f32 1.5, %v547_v44  ;;  %v579_v44 = vld [vmem:[%s2254_s23 + $0xdb8] sm:$0xff] }
 0x1a5   : > { %1692 = vst [vmem:[%s2267_s16 + $0xbc0] sm:$0xff] %v1104_v51  ;;  %v1136_v51 = vmul.f32 1.5, %v548_v46  ;;  %v580_v46 = vld [vmem:[%s2254_s23 + $0xdc0] sm:$0xff] }
 0x1a6   : > { %1693 = vst [vmem:[%s2267_s16 + $0xbc8] sm:$0xff] %v1105_v53  ;;  %v1137_v53 = vmul.f32 1.5, %v549_v48  ;;  %v581_v48 = vld [vmem:[%s2254_s23 + $0xdc8] sm:$0xff] }
 0x1a7   : > { %1694 = vst [vmem:[%s2267_s16 + $0xbd0] sm:$0xff] %v1106_v55  ;;  %v1138_v55 = vmul.f32 1.5, %v550_v50  ;;  %v582_v50 = vld [vmem:[%s2254_s23 + $0xdd0] sm:$0xff] }
 0x1a8   : > { %1695 = vst [vmem:[%s2267_s16 + $0xbd8] sm:$0xff] %v1107_v57  ;;  %v1139_v57 = vmul.f32 1.5, %v551_v52  ;;  %v583_v52 = vld [vmem:[%s2254_s23 + $0xdd8] sm:$0xff] }
 0x1a9   : > { %1696 = vst [vmem:[%s2267_s16 + $0xbe0] sm:$0xff] %v1108_v59  ;;  %v1140_v59 = vmul.f32 1.5, %v552_v54  ;;  %v584_v54 = vld [vmem:[%s2254_s23 + $0xde0] sm:$0xff] }
 0x1aa   : > { %1697 = vst [vmem:[%s2267_s16 + $0xbe8] sm:$0xff] %v1109_v61  ;;  %v1141_v61 = vmul.f32 1.5, %v553_v56  ;;  %v585_v56 = vld [vmem:[%s2254_s23 + $0xde8] sm:$0xff] }
 0x1ab   : > { %1698 = vst [vmem:[%s2267_s16 + $0xbf0] sm:$0xff] %v1110_v63  ;;  %v1142_v63 = vmul.f32 1.5, %v554_v58  ;;  %v586_v58 = vld [vmem:[%s2254_s23 + $0xdf0] sm:$0xff] }
 0x1ac   : > { %1699 = vst [vmem:[%s2267_s16 + $0xbf8] sm:$0xff] %v1111_v1  ;;  %v1143_v1 = vmul.f32 1.5, %v555_v60  ;;  %v587_v60 = vld [vmem:[%s2254_s23 + $0xdf8] sm:$0xff] }
 0x1ad   : > { %1700 = vst [vmem:[%s2267_s16 + $0xc00] sm:$0xff] %v1112_v3  ;;  %v1144_v3 = vmul.f32 1.5, %v556_v62  ;;  %v588_v62 = vld [vmem:[%s2254_s23 + $0xe00] sm:$0xff] }
 0x1ae   : > { %1701 = vst [vmem:[%s2267_s16 + $0xc08] sm:$0xff] %v1113_v5  ;;  %v1145_v5 = vmul.f32 1.5, %v557_v0  ;;  %v589_v0 = vld [vmem:[%s2254_s23 + $0xe08] sm:$0xff] }
 0x1af   : > { %1702 = vst [vmem:[%s2267_s16 + $0xc10] sm:$0xff] %v1114_v7  ;;  %v1146_v7 = vmul.f32 1.5, %v558_v2  ;;  %v590_v2 = vld [vmem:[%s2254_s23 + $0xe10] sm:$0xff] }
 0x1b0   : > { %1703 = vst [vmem:[%s2267_s16 + $0xc18] sm:$0xff] %v1115_v9  ;;  %v1147_v9 = vmul.f32 1.5, %v559_v4  ;;  %v591_v4 = vld [vmem:[%s2254_s23 + $0xe18] sm:$0xff] }
 0x1b1   : > { %1704 = vst [vmem:[%s2267_s16 + $0xc20] sm:$0xff] %v1116_v11  ;;  %v1148_v11 = vmul.f32 1.5, %v560_v6  ;;  %v592_v6 = vld [vmem:[%s2254_s23 + $0xe20] sm:$0xff] }
 0x1b2   : > { %1705 = vst [vmem:[%s2267_s16 + $0xc28] sm:$0xff] %v1117_v13  ;;  %v1149_v13 = vmul.f32 1.5, %v561_v8  ;;  %v593_v8 = vld [vmem:[%s2254_s23 + $0xe28] sm:$0xff] }
 0x1b3   : > { %1706 = vst [vmem:[%s2267_s16 + $0xc30] sm:$0xff] %v1118_v15  ;;  %v1150_v15 = vmul.f32 1.5, %v562_v10  ;;  %v594_v10 = vld [vmem:[%s2254_s23 + $0xe30] sm:$0xff] }
 0x1b4   : > { %1707 = vst [vmem:[%s2267_s16 + $0xc38] sm:$0xff] %v1119_v17  ;;  %v1151_v17 = vmul.f32 1.5, %v563_v12  ;;  %v595_v12 = vld [vmem:[%s2254_s23 + $0xe38] sm:$0xff] }
 0x1b5   : > { %1708 = vst [vmem:[%s2267_s16 + $0xc40] sm:$0xff] %v1120_v19  ;;  %v1152_v19 = vmul.f32 1.5, %v564_v14  ;;  %v596_v14 = vld [vmem:[%s2254_s23 + $0xe40] sm:$0xff] }
 0x1b6   : > { %1709 = vst [vmem:[%s2267_s16 + $0xc48] sm:$0xff] %v1121_v21  ;;  %v1153_v21 = vmul.f32 1.5, %v565_v16  ;;  %v597_v16 = vld [vmem:[%s2254_s23 + $0xe48] sm:$0xff] }
 0x1b7   : > { %1710 = vst [vmem:[%s2267_s16 + $0xc50] sm:$0xff] %v1122_v23  ;;  %v1154_v23 = vmul.f32 1.5, %v566_v18  ;;  %v598_v18 = vld [vmem:[%s2254_s23 + $0xe50] sm:$0xff] }
 0x1b8   : > { %1711 = vst [vmem:[%s2267_s16 + $0xc58] sm:$0xff] %v1123_v25  ;;  %v1155_v25 = vmul.f32 1.5, %v567_v20  ;;  %v599_v20 = vld [vmem:[%s2254_s23 + $0xe58] sm:$0xff] }
 0x1b9   : > { %1712 = vst [vmem:[%s2267_s16 + $0xc60] sm:$0xff] %v1124_v27  ;;  %v1156_v27 = vmul.f32 1.5, %v568_v22  ;;  %v600_v22 = vld [vmem:[%s2254_s23 + $0xe60] sm:$0xff] }
 0x1ba   : > { %1713 = vst [vmem:[%s2267_s16 + $0xc68] sm:$0xff] %v1125_v29  ;;  %v1157_v29 = vmul.f32 1.5, %v569_v24  ;;  %v601_v24 = vld [vmem:[%s2254_s23 + $0xe68] sm:$0xff] }
 0x1bb   : > { %1714 = vst [vmem:[%s2267_s16 + $0xc70] sm:$0xff] %v1126_v31  ;;  %v1158_v31 = vmul.f32 1.5, %v570_v26  ;;  %v602_v26 = vld [vmem:[%s2254_s23 + $0xe70] sm:$0xff] }
 0x1bc   : > { %1715 = vst [vmem:[%s2267_s16 + $0xc78] sm:$0xff] %v1127_v33  ;;  %v1159_v33 = vmul.f32 1.5, %v571_v28  ;;  %v603_v28 = vld [vmem:[%s2254_s23 + $0xe78] sm:$0xff] }
 0x1bd   : > { %1716 = vst [vmem:[%s2267_s16 + $0xc80] sm:$0xff] %v1128_v35  ;;  %v1160_v35 = vmul.f32 1.5, %v572_v30  ;;  %v604_v30 = vld [vmem:[%s2254_s23 + $0xe80] sm:$0xff] }
 0x1be   : > { %1717 = vst [vmem:[%s2267_s16 + $0xc88] sm:$0xff] %v1129_v37  ;;  %v1161_v37 = vmul.f32 1.5, %v573_v32  ;;  %v605_v32 = vld [vmem:[%s2254_s23 + $0xe88] sm:$0xff] }
 0x1bf   : > { %1718 = vst [vmem:[%s2267_s16 + $0xc90] sm:$0xff] %v1130_v39  ;;  %v1162_v39 = vmul.f32 1.5, %v574_v34  ;;  %v606_v34 = vld [vmem:[%s2254_s23 + $0xe90] sm:$0xff] }
 0x1c0   : > { %1719 = vst [vmem:[%s2267_s16 + $0xc98] sm:$0xff] %v1131_v41  ;;  %v1163_v41 = vmul.f32 1.5, %v575_v36  ;;  %v607_v36 = vld [vmem:[%s2254_s23 + $0xe98] sm:$0xff] }
 0x1c1   : > { %1720 = vst [vmem:[%s2267_s16 + $0xca0] sm:$0xff] %v1132_v43  ;;  %v1164_v43 = vmul.f32 1.5, %v576_v38  ;;  %v608_v38 = vld [vmem:[%s2254_s23 + $0xea0] sm:$0xff] }
 0x1c2   : > { %1721 = vst [vmem:[%s2267_s16 + $0xca8] sm:$0xff] %v1133_v45  ;;  %v1165_v45 = vmul.f32 1.5, %v577_v40  ;;  %v609_v40 = vld [vmem:[%s2254_s23 + $0xea8] sm:$0xff] }
 0x1c3   : > { %1722 = vst [vmem:[%s2267_s16 + $0xcb0] sm:$0xff] %v1134_v47  ;;  %v1166_v47 = vmul.f32 1.5, %v578_v42  ;;  %v610_v42 = vld [vmem:[%s2254_s23 + $0xeb0] sm:$0xff] }
 0x1c4   : > { %1723 = vst [vmem:[%s2267_s16 + $0xcb8] sm:$0xff] %v1135_v49  ;;  %v1167_v49 = vmul.f32 1.5, %v579_v44  ;;  %v611_v44 = vld [vmem:[%s2254_s23 + $0xeb8] sm:$0xff] }
 0x1c5   : > { %1724 = vst [vmem:[%s2267_s16 + $0xcc0] sm:$0xff] %v1136_v51  ;;  %v1168_v51 = vmul.f32 1.5, %v580_v46  ;;  %v612_v46 = vld [vmem:[%s2254_s23 + $0xec0] sm:$0xff] }
 0x1c6   : > { %1725 = vst [vmem:[%s2267_s16 + $0xcc8] sm:$0xff] %v1137_v53  ;;  %v1169_v53 = vmul.f32 1.5, %v581_v48  ;;  %v613_v48 = vld [vmem:[%s2254_s23 + $0xec8] sm:$0xff] }
 0x1c7   : > { %1726 = vst [vmem:[%s2267_s16 + $0xcd0] sm:$0xff] %v1138_v55  ;;  %v1170_v55 = vmul.f32 1.5, %v582_v50  ;;  %v614_v50 = vld [vmem:[%s2254_s23 + $0xed0] sm:$0xff] }
 0x1c8   : > { %1727 = vst [vmem:[%s2267_s16 + $0xcd8] sm:$0xff] %v1139_v57  ;;  %v1171_v57 = vmul.f32 1.5, %v583_v52  ;;  %v615_v52 = vld [vmem:[%s2254_s23 + $0xed8] sm:$0xff] }
 0x1c9   : > { %1728 = vst [vmem:[%s2267_s16 + $0xce0] sm:$0xff] %v1140_v59  ;;  %v1172_v59 = vmul.f32 1.5, %v584_v54  ;;  %v616_v54 = vld [vmem:[%s2254_s23 + $0xee0] sm:$0xff] }
 0x1ca   : > { %1729 = vst [vmem:[%s2267_s16 + $0xce8] sm:$0xff] %v1141_v61  ;;  %v1173_v61 = vmul.f32 1.5, %v585_v56  ;;  %v617_v56 = vld [vmem:[%s2254_s23 + $0xee8] sm:$0xff] }
 0x1cb   : > { %1730 = vst [vmem:[%s2267_s16 + $0xcf0] sm:$0xff] %v1142_v63  ;;  %v1174_v63 = vmul.f32 1.5, %v586_v58  ;;  %v618_v58 = vld [vmem:[%s2254_s23 + $0xef0] sm:$0xff] }
 0x1cc   : > { %1731 = vst [vmem:[%s2267_s16 + $0xcf8] sm:$0xff] %v1143_v1  ;;  %v1175_v1 = vmul.f32 1.5, %v587_v60  ;;  %v619_v60 = vld [vmem:[%s2254_s23 + $0xef8] sm:$0xff] }
 0x1cd   : > { %1732 = vst [vmem:[%s2267_s16 + $0xd00] sm:$0xff] %v1144_v3  ;;  %v1176_v3 = vmul.f32 1.5, %v588_v62  ;;  %v620_v62 = vld [vmem:[%s2254_s23 + $0xf00] sm:$0xff] }
 0x1ce   : > { %1733 = vst [vmem:[%s2267_s16 + $0xd08] sm:$0xff] %v1145_v5  ;;  %v1177_v5 = vmul.f32 1.5, %v589_v0  ;;  %v621_v0 = vld [vmem:[%s2254_s23 + $0xf08] sm:$0xff] }
 0x1cf   : > { %1734 = vst [vmem:[%s2267_s16 + $0xd10] sm:$0xff] %v1146_v7  ;;  %v1178_v7 = vmul.f32 1.5, %v590_v2  ;;  %v622_v2 = vld [vmem:[%s2254_s23 + $0xf10] sm:$0xff] }
 0x1d0   : > { %1735 = vst [vmem:[%s2267_s16 + $0xd18] sm:$0xff] %v1147_v9  ;;  %v1179_v9 = vmul.f32 1.5, %v591_v4  ;;  %v623_v4 = vld [vmem:[%s2254_s23 + $0xf18] sm:$0xff] }
 0x1d1   : > { %1736 = vst [vmem:[%s2267_s16 + $0xd20] sm:$0xff] %v1148_v11  ;;  %v1180_v11 = vmul.f32 1.5, %v592_v6  ;;  %v624_v6 = vld [vmem:[%s2254_s23 + $0xf20] sm:$0xff] }
 0x1d2   : > { %1737 = vst [vmem:[%s2267_s16 + $0xd28] sm:$0xff] %v1149_v13  ;;  %v1181_v13 = vmul.f32 1.5, %v593_v8  ;;  %v625_v8 = vld [vmem:[%s2254_s23 + $0xf28] sm:$0xff] }
 0x1d3   : > { %1738 = vst [vmem:[%s2267_s16 + $0xd30] sm:$0xff] %v1150_v15  ;;  %v1182_v15 = vmul.f32 1.5, %v594_v10  ;;  %v626_v10 = vld [vmem:[%s2254_s23 + $0xf30] sm:$0xff] }
 0x1d4   : > { %1739 = vst [vmem:[%s2267_s16 + $0xd38] sm:$0xff] %v1151_v17  ;;  %v1183_v17 = vmul.f32 1.5, %v595_v12  ;;  %v627_v12 = vld [vmem:[%s2254_s23 + $0xf38] sm:$0xff] }
 0x1d5   : > { %1740 = vst [vmem:[%s2267_s16 + $0xd40] sm:$0xff] %v1152_v19  ;;  %v1184_v19 = vmul.f32 1.5, %v596_v14  ;;  %v628_v14 = vld [vmem:[%s2254_s23 + $0xf40] sm:$0xff] }
 0x1d6   : > { %1741 = vst [vmem:[%s2267_s16 + $0xd48] sm:$0xff] %v1153_v21  ;;  %v1185_v21 = vmul.f32 1.5, %v597_v16  ;;  %v629_v16 = vld [vmem:[%s2254_s23 + $0xf48] sm:$0xff] }
 0x1d7   : > { %1742 = vst [vmem:[%s2267_s16 + $0xd50] sm:$0xff] %v1154_v23  ;;  %v1186_v23 = vmul.f32 1.5, %v598_v18  ;;  %v630_v18 = vld [vmem:[%s2254_s23 + $0xf50] sm:$0xff] }
 0x1d8   : > { %1743 = vst [vmem:[%s2267_s16 + $0xd58] sm:$0xff] %v1155_v25  ;;  %v1187_v25 = vmul.f32 1.5, %v599_v20  ;;  %v631_v20 = vld [vmem:[%s2254_s23 + $0xf58] sm:$0xff] }
 0x1d9   : > { %1744 = vst [vmem:[%s2267_s16 + $0xd60] sm:$0xff] %v1156_v27  ;;  %v1188_v27 = vmul.f32 1.5, %v600_v22  ;;  %v632_v22 = vld [vmem:[%s2254_s23 + $0xf60] sm:$0xff] }
 0x1da   : > { %1745 = vst [vmem:[%s2267_s16 + $0xd68] sm:$0xff] %v1157_v29  ;;  %v1189_v29 = vmul.f32 1.5, %v601_v24  ;;  %v633_v24 = vld [vmem:[%s2254_s23 + $0xf68] sm:$0xff] }
 0x1db   : > { %1746 = vst [vmem:[%s2267_s16 + $0xd70] sm:$0xff] %v1158_v31  ;;  %v1190_v31 = vmul.f32 1.5, %v602_v26  ;;  %v634_v26 = vld [vmem:[%s2254_s23 + $0xf70] sm:$0xff] }
 0x1dc   : > { %1747 = vst [vmem:[%s2267_s16 + $0xd78] sm:$0xff] %v1159_v33  ;;  %v1191_v33 = vmul.f32 1.5, %v603_v28  ;;  %v635_v28 = vld [vmem:[%s2254_s23 + $0xf78] sm:$0xff] }
 0x1dd   : > { %1748 = vst [vmem:[%s2267_s16 + $0xd80] sm:$0xff] %v1160_v35  ;;  %v1192_v35 = vmul.f32 1.5, %v604_v30  ;;  %v636_v30 = vld [vmem:[%s2254_s23 + $0xf80] sm:$0xff] }
 0x1de   : > { %1749 = vst [vmem:[%s2267_s16 + $0xd88] sm:$0xff] %v1161_v37  ;;  %v1193_v37 = vmul.f32 1.5, %v605_v32  ;;  %v637_v32 = vld [vmem:[%s2254_s23 + $0xf88] sm:$0xff] }
 0x1df   : > { %1750 = vst [vmem:[%s2267_s16 + $0xd90] sm:$0xff] %v1162_v39  ;;  %v1194_v39 = vmul.f32 1.5, %v606_v34  ;;  %v638_v34 = vld [vmem:[%s2254_s23 + $0xf90] sm:$0xff] }
 0x1e0   : > { %1751 = vst [vmem:[%s2267_s16 + $0xd98] sm:$0xff] %v1163_v41  ;;  %v1195_v41 = vmul.f32 1.5, %v607_v36  ;;  %v639_v36 = vld [vmem:[%s2254_s23 + $0xf98] sm:$0xff] }
 0x1e1   : > { %1752 = vst [vmem:[%s2267_s16 + $0xda0] sm:$0xff] %v1164_v43  ;;  %v1196_v43 = vmul.f32 1.5, %v608_v38  ;;  %v640_v38 = vld [vmem:[%s2254_s23 + $0xfa0] sm:$0xff] }
 0x1e2   : > { %1753 = vst [vmem:[%s2267_s16 + $0xda8] sm:$0xff] %v1165_v45  ;;  %v1197_v45 = vmul.f32 1.5, %v609_v40  ;;  %v641_v40 = vld [vmem:[%s2254_s23 + $0xfa8] sm:$0xff] }
 0x1e3   : > { %1754 = vst [vmem:[%s2267_s16 + $0xdb0] sm:$0xff] %v1166_v47  ;;  %v1198_v47 = vmul.f32 1.5, %v610_v42  ;;  %v642_v42 = vld [vmem:[%s2254_s23 + $0xfb0] sm:$0xff] }
 0x1e4   : > { %1755 = vst [vmem:[%s2267_s16 + $0xdb8] sm:$0xff] %v1167_v49  ;;  %v1199_v49 = vmul.f32 1.5, %v611_v44  ;;  %v643_v44 = vld [vmem:[%s2254_s23 + $0xfb8] sm:$0xff] }
 0x1e5   : > { %1756 = vst [vmem:[%s2267_s16 + $0xdc0] sm:$0xff] %v1168_v51  ;;  %v1200_v51 = vmul.f32 1.5, %v612_v46  ;;  %v644_v46 = vld [vmem:[%s2254_s23 + $0xfc0] sm:$0xff] }
 0x1e6   : > { %1757 = vst [vmem:[%s2267_s16 + $0xdc8] sm:$0xff] %v1169_v53  ;;  %v1201_v53 = vmul.f32 1.5, %v613_v48  ;;  %v645_v48 = vld [vmem:[%s2254_s23 + $0xfc8] sm:$0xff] }
 0x1e7   : > { %1758 = vst [vmem:[%s2267_s16 + $0xdd0] sm:$0xff] %v1170_v55  ;;  %v1202_v55 = vmul.f32 1.5, %v614_v50  ;;  %v646_v50 = vld [vmem:[%s2254_s23 + $0xfd0] sm:$0xff] }
 0x1e8   : > { %1759 = vst [vmem:[%s2267_s16 + $0xdd8] sm:$0xff] %v1171_v57  ;;  %v1203_v57 = vmul.f32 1.5, %v615_v52  ;;  %v647_v52 = vld [vmem:[%s2254_s23 + $0xfd8] sm:$0xff] }
 0x1e9   : > { %1760 = vst [vmem:[%s2267_s16 + $0xde0] sm:$0xff] %v1172_v59  ;;  %v1204_v59 = vmul.f32 1.5, %v616_v54  ;;  %v648_v54 = vld [vmem:[%s2254_s23 + $0xfe0] sm:$0xff] }
 0x1ea   : > { %1761 = vst [vmem:[%s2267_s16 + $0xde8] sm:$0xff] %v1173_v61  ;;  %v1205_v61 = vmul.f32 1.5, %v617_v56  ;;  %v649_v56 = vld [vmem:[%s2254_s23 + $0xfe8] sm:$0xff] }
 0x1eb   : > { %1762 = vst [vmem:[%s2267_s16 + $0xdf0] sm:$0xff] %v1174_v63  ;;  %v1206_v63 = vmul.f32 1.5, %v618_v58  ;;  %v650_v58 = vld [vmem:[%s2254_s23 + $0xff0] sm:$0xff] }
 0x1ec   : > { %1763 = vst [vmem:[%s2267_s16 + $0xdf8] sm:$0xff] %v1175_v1  ;;  %v1207_v1 = vmul.f32 1.5, %v619_v60  ;;  %v651_v60 = vld [vmem:[%s2254_s23 + $0xff8] sm:$0xff] }
 0x1ed   : > { %1764 = vst [vmem:[%s2267_s16 + $0xe00] sm:$0xff] %v1176_v3  ;;  %v1208_v3 = vmul.f32 1.5, %v620_v62  ;;  %v652_v62 = vld [vmem:[%s2254_s23 + $0x1000] sm:$0xff] }
 0x1ee   : > { %1765 = vst [vmem:[%s2267_s16 + $0xe08] sm:$0xff] %v1177_v5  ;;  %v1209_v5 = vmul.f32 1.5, %v621_v0  ;;  %v653_v0 = vld [vmem:[%s2254_s23 + $0x1008] sm:$0xff] }
 0x1ef   : > { %1766 = vst [vmem:[%s2267_s16 + $0xe10] sm:$0xff] %v1178_v7  ;;  %v1210_v7 = vmul.f32 1.5, %v622_v2  ;;  %v654_v2 = vld [vmem:[%s2254_s23 + $0x1010] sm:$0xff] }
 0x1f0   : > { %1767 = vst [vmem:[%s2267_s16 + $0xe18] sm:$0xff] %v1179_v9  ;;  %v1211_v9 = vmul.f32 1.5, %v623_v4  ;;  %v655_v4 = vld [vmem:[%s2254_s23 + $0x1018] sm:$0xff] }
 0x1f1   : > { %1768 = vst [vmem:[%s2267_s16 + $0xe20] sm:$0xff] %v1180_v11  ;;  %v1212_v11 = vmul.f32 1.5, %v624_v6  ;;  %v656_v6 = vld [vmem:[%s2254_s23 + $0x1020] sm:$0xff] }
 0x1f2   : > { %1769 = vst [vmem:[%s2267_s16 + $0xe28] sm:$0xff] %v1181_v13  ;;  %v1213_v13 = vmul.f32 1.5, %v625_v8  ;;  %v657_v8 = vld [vmem:[%s2254_s23 + $0x1028] sm:$0xff] }
 0x1f3   : > { %1770 = vst [vmem:[%s2267_s16 + $0xe30] sm:$0xff] %v1182_v15  ;;  %v1214_v15 = vmul.f32 1.5, %v626_v10  ;;  %v658_v10 = vld [vmem:[%s2254_s23 + $0x1030] sm:$0xff] }
 0x1f4   : > { %1771 = vst [vmem:[%s2267_s16 + $0xe38] sm:$0xff] %v1183_v17  ;;  %v1215_v17 = vmul.f32 1.5, %v627_v12  ;;  %v659_v12 = vld [vmem:[%s2254_s23 + $0x1038] sm:$0xff] }
 0x1f5   : > { %1772 = vst [vmem:[%s2267_s16 + $0xe40] sm:$0xff] %v1184_v19  ;;  %v1216_v19 = vmul.f32 1.5, %v628_v14  ;;  %v660_v14 = vld [vmem:[%s2254_s23 + $0x1040] sm:$0xff] }
 0x1f6   : > { %1773 = vst [vmem:[%s2267_s16 + $0xe48] sm:$0xff] %v1185_v21  ;;  %v1217_v21 = vmul.f32 1.5, %v629_v16  ;;  %v661_v16 = vld [vmem:[%s2254_s23 + $0x1048] sm:$0xff] }
 0x1f7   : > { %1774 = vst [vmem:[%s2267_s16 + $0xe50] sm:$0xff] %v1186_v23  ;;  %v1218_v23 = vmul.f32 1.5, %v630_v18  ;;  %v662_v18 = vld [vmem:[%s2254_s23 + $0x1050] sm:$0xff] }
 0x1f8   : > { %1775 = vst [vmem:[%s2267_s16 + $0xe58] sm:$0xff] %v1187_v25  ;;  %v1219_v25 = vmul.f32 1.5, %v631_v20  ;;  %v663_v20 = vld [vmem:[%s2254_s23 + $0x1058] sm:$0xff] }
 0x1f9   : > { %1776 = vst [vmem:[%s2267_s16 + $0xe60] sm:$0xff] %v1188_v27  ;;  %v1220_v27 = vmul.f32 1.5, %v632_v22  ;;  %v664_v22 = vld [vmem:[%s2254_s23 + $0x1060] sm:$0xff] }
 0x1fa   : > { %1777 = vst [vmem:[%s2267_s16 + $0xe68] sm:$0xff] %v1189_v29  ;;  %v1221_v29 = vmul.f32 1.5, %v633_v24  ;;  %v665_v24 = vld [vmem:[%s2254_s23 + $0x1068] sm:$0xff] }
 0x1fb   : > { %1778 = vst [vmem:[%s2267_s16 + $0xe70] sm:$0xff] %v1190_v31  ;;  %v1222_v31 = vmul.f32 1.5, %v634_v26  ;;  %v666_v26 = vld [vmem:[%s2254_s23 + $0x1070] sm:$0xff] }
 0x1fc   : > { %1779 = vst [vmem:[%s2267_s16 + $0xe78] sm:$0xff] %v1191_v33  ;;  %v1223_v33 = vmul.f32 1.5, %v635_v28  ;;  %v667_v28 = vld [vmem:[%s2254_s23 + $0x1078] sm:$0xff] }
 0x1fd   : > { %1780 = vst [vmem:[%s2267_s16 + $0xe80] sm:$0xff] %v1192_v35  ;;  %v1224_v35 = vmul.f32 1.5, %v636_v30  ;;  %v668_v30 = vld [vmem:[%s2254_s23 + $0x1080] sm:$0xff] }
 0x1fe   : > { %1781 = vst [vmem:[%s2267_s16 + $0xe88] sm:$0xff] %v1193_v37  ;;  %v1225_v37 = vmul.f32 1.5, %v637_v32  ;;  %v669_v32 = vld [vmem:[%s2254_s23 + $0x1088] sm:$0xff] }
 0x1ff   : > { %1782 = vst [vmem:[%s2267_s16 + $0xe90] sm:$0xff] %v1194_v39  ;;  %v1226_v39 = vmul.f32 1.5, %v638_v34  ;;  %v670_v34 = vld [vmem:[%s2254_s23 + $0x1090] sm:$0xff] }
 0x200   : > { %1783 = vst [vmem:[%s2267_s16 + $0xe98] sm:$0xff] %v1195_v41  ;;  %v1227_v41 = vmul.f32 1.5, %v639_v36  ;;  %v671_v36 = vld [vmem:[%s2254_s23 + $0x1098] sm:$0xff] }
 0x201   : > { %1784 = vst [vmem:[%s2267_s16 + $0xea0] sm:$0xff] %v1196_v43  ;;  %v1228_v43 = vmul.f32 1.5, %v640_v38  ;;  %v672_v38 = vld [vmem:[%s2254_s23 + $0x10a0] sm:$0xff] }
 0x202   : > { %1785 = vst [vmem:[%s2267_s16 + $0xea8] sm:$0xff] %v1197_v45  ;;  %v1229_v45 = vmul.f32 1.5, %v641_v40  ;;  %v673_v40 = vld [vmem:[%s2254_s23 + $0x10a8] sm:$0xff] }
 0x203   : > { %1786 = vst [vmem:[%s2267_s16 + $0xeb0] sm:$0xff] %v1198_v47  ;;  %v1230_v47 = vmul.f32 1.5, %v642_v42  ;;  %v674_v42 = vld [vmem:[%s2254_s23 + $0x10b0] sm:$0xff] }
 0x204   : > { %1787 = vst [vmem:[%s2267_s16 + $0xeb8] sm:$0xff] %v1199_v49  ;;  %v1231_v49 = vmul.f32 1.5, %v643_v44  ;;  %v675_v44 = vld [vmem:[%s2254_s23 + $0x10b8] sm:$0xff] }
 0x205   : > { %1788 = vst [vmem:[%s2267_s16 + $0xec0] sm:$0xff] %v1200_v51  ;;  %v1232_v51 = vmul.f32 1.5, %v644_v46  ;;  %v676_v46 = vld [vmem:[%s2254_s23 + $0x10c0] sm:$0xff] }
 0x206   : > { %1789 = vst [vmem:[%s2267_s16 + $0xec8] sm:$0xff] %v1201_v53  ;;  %v1233_v53 = vmul.f32 1.5, %v645_v48  ;;  %v677_v48 = vld [vmem:[%s2254_s23 + $0x10c8] sm:$0xff] }
 0x207   : > { %1790 = vst [vmem:[%s2267_s16 + $0xed0] sm:$0xff] %v1202_v55  ;;  %v1234_v55 = vmul.f32 1.5, %v646_v50  ;;  %v678_v50 = vld [vmem:[%s2254_s23 + $0x10d0] sm:$0xff] }
 0x208   : > { %1791 = vst [vmem:[%s2267_s16 + $0xed8] sm:$0xff] %v1203_v57  ;;  %v1235_v57 = vmul.f32 1.5, %v647_v52  ;;  %v679_v52 = vld [vmem:[%s2254_s23 + $0x10d8] sm:$0xff] }
 0x209   : > { %1792 = vst [vmem:[%s2267_s16 + $0xee0] sm:$0xff] %v1204_v59  ;;  %v1236_v59 = vmul.f32 1.5, %v648_v54  ;;  %v680_v54 = vld [vmem:[%s2254_s23 + $0x10e0] sm:$0xff] }
 0x20a   : > { %1793 = vst [vmem:[%s2267_s16 + $0xee8] sm:$0xff] %v1205_v61  ;;  %v1237_v61 = vmul.f32 1.5, %v649_v56  ;;  %v681_v56 = vld [vmem:[%s2254_s23 + $0x10e8] sm:$0xff] }
 0x20b   : > { %1794 = vst [vmem:[%s2267_s16 + $0xef0] sm:$0xff] %v1206_v63  ;;  %v1238_v63 = vmul.f32 1.5, %v650_v58  ;;  %v682_v58 = vld [vmem:[%s2254_s23 + $0x10f0] sm:$0xff] }
 0x20c   : > { %1795 = vst [vmem:[%s2267_s16 + $0xef8] sm:$0xff] %v1207_v1  ;;  %v1239_v1 = vmul.f32 1.5, %v651_v60  ;;  %v683_v60 = vld [vmem:[%s2254_s23 + $0x10f8] sm:$0xff] }
 0x20d   : > { %1796 = vst [vmem:[%s2267_s16 + $0xf00] sm:$0xff] %v1208_v3  ;;  %v1240_v3 = vmul.f32 1.5, %v652_v62  ;;  %v684_v62 = vld [vmem:[%s2254_s23 + $0x1100] sm:$0xff] }
 0x20e   : > { %1797 = vst [vmem:[%s2267_s16 + $0xf08] sm:$0xff] %v1209_v5  ;;  %v1241_v5 = vmul.f32 1.5, %v653_v0  ;;  %v685_v0 = vld [vmem:[%s2254_s23 + $0x1108] sm:$0xff] }
 0x20f   : > { %1798 = vst [vmem:[%s2267_s16 + $0xf10] sm:$0xff] %v1210_v7  ;;  %v1242_v7 = vmul.f32 1.5, %v654_v2  ;;  %v686_v2 = vld [vmem:[%s2254_s23 + $0x1110] sm:$0xff] }
 0x210   : > { %1799 = vst [vmem:[%s2267_s16 + $0xf18] sm:$0xff] %v1211_v9  ;;  %v1243_v9 = vmul.f32 1.5, %v655_v4  ;;  %v687_v4 = vld [vmem:[%s2254_s23 + $0x1118] sm:$0xff] }
 0x211   : > { %1800 = vst [vmem:[%s2267_s16 + $0xf20] sm:$0xff] %v1212_v11  ;;  %v1244_v11 = vmul.f32 1.5, %v656_v6  ;;  %v688_v6 = vld [vmem:[%s2254_s23 + $0x1120] sm:$0xff] }
 0x212   : > { %1801 = vst [vmem:[%s2267_s16 + $0xf28] sm:$0xff] %v1213_v13  ;;  %v1245_v13 = vmul.f32 1.5, %v657_v8  ;;  %v689_v8 = vld [vmem:[%s2254_s23 + $0x1128] sm:$0xff] }
 0x213   : > { %1802 = vst [vmem:[%s2267_s16 + $0xf30] sm:$0xff] %v1214_v15  ;;  %v1246_v15 = vmul.f32 1.5, %v658_v10  ;;  %v690_v10 = vld [vmem:[%s2254_s23 + $0x1130] sm:$0xff] }
 0x214   : > { %1803 = vst [vmem:[%s2267_s16 + $0xf38] sm:$0xff] %v1215_v17  ;;  %v1247_v17 = vmul.f32 1.5, %v659_v12  ;;  %v691_v12 = vld [vmem:[%s2254_s23 + $0x1138] sm:$0xff] }
 0x215   : > { %1804 = vst [vmem:[%s2267_s16 + $0xf40] sm:$0xff] %v1216_v19  ;;  %v1248_v19 = vmul.f32 1.5, %v660_v14  ;;  %v692_v14 = vld [vmem:[%s2254_s23 + $0x1140] sm:$0xff] }
 0x216   : > { %1805 = vst [vmem:[%s2267_s16 + $0xf48] sm:$0xff] %v1217_v21  ;;  %v1249_v21 = vmul.f32 1.5, %v661_v16  ;;  %v693_v16 = vld [vmem:[%s2254_s23 + $0x1148] sm:$0xff] }
 0x217   : > { %1806 = vst [vmem:[%s2267_s16 + $0xf50] sm:$0xff] %v1218_v23  ;;  %v1250_v23 = vmul.f32 1.5, %v662_v18  ;;  %v694_v18 = vld [vmem:[%s2254_s23 + $0x1150] sm:$0xff] }
 0x218   : > { %1807 = vst [vmem:[%s2267_s16 + $0xf58] sm:$0xff] %v1219_v25  ;;  %v1251_v25 = vmul.f32 1.5, %v663_v20  ;;  %v695_v20 = vld [vmem:[%s2254_s23 + $0x1158] sm:$0xff] }
 0x219   : > { %1808 = vst [vmem:[%s2267_s16 + $0xf60] sm:$0xff] %v1220_v27  ;;  %v1252_v27 = vmul.f32 1.5, %v664_v22  ;;  %v696_v22 = vld [vmem:[%s2254_s23 + $0x1160] sm:$0xff] }
 0x21a   : > { %1809 = vst [vmem:[%s2267_s16 + $0xf68] sm:$0xff] %v1221_v29  ;;  %v1253_v29 = vmul.f32 1.5, %v665_v24  ;;  %v697_v24 = vld [vmem:[%s2254_s23 + $0x1168] sm:$0xff] }
 0x21b   : > { %1810 = vst [vmem:[%s2267_s16 + $0xf70] sm:$0xff] %v1222_v31  ;;  %v1254_v31 = vmul.f32 1.5, %v666_v26  ;;  %v698_v26 = vld [vmem:[%s2254_s23 + $0x1170] sm:$0xff] }
 0x21c   : > { %1811 = vst [vmem:[%s2267_s16 + $0xf78] sm:$0xff] %v1223_v33  ;;  %v1255_v33 = vmul.f32 1.5, %v667_v28  ;;  %v699_v28 = vld [vmem:[%s2254_s23 + $0x1178] sm:$0xff] }
 0x21d   : > { %1812 = vst [vmem:[%s2267_s16 + $0xf80] sm:$0xff] %v1224_v35  ;;  %v1256_v35 = vmul.f32 1.5, %v668_v30  ;;  %v700_v30 = vld [vmem:[%s2254_s23 + $0x1180] sm:$0xff] }
 0x21e   : > { %1813 = vst [vmem:[%s2267_s16 + $0xf88] sm:$0xff] %v1225_v37  ;;  %v1257_v37 = vmul.f32 1.5, %v669_v32  ;;  %v701_v32 = vld [vmem:[%s2254_s23 + $0x1188] sm:$0xff] }
 0x21f   : > { %1814 = vst [vmem:[%s2267_s16 + $0xf90] sm:$0xff] %v1226_v39  ;;  %v1258_v39 = vmul.f32 1.5, %v670_v34  ;;  %v702_v34 = vld [vmem:[%s2254_s23 + $0x1190] sm:$0xff] }
 0x220   : > { %1815 = vst [vmem:[%s2267_s16 + $0xf98] sm:$0xff] %v1227_v41  ;;  %v1259_v41 = vmul.f32 1.5, %v671_v36  ;;  %v703_v36 = vld [vmem:[%s2254_s23 + $0x1198] sm:$0xff] }
 0x221   : > { %1816 = vst [vmem:[%s2267_s16 + $0xfa0] sm:$0xff] %v1228_v43  ;;  %v1260_v43 = vmul.f32 1.5, %v672_v38  ;;  %v704_v38 = vld [vmem:[%s2254_s23 + $0x11a0] sm:$0xff] }
 0x222   : > { %1817 = vst [vmem:[%s2267_s16 + $0xfa8] sm:$0xff] %v1229_v45  ;;  %v1261_v45 = vmul.f32 1.5, %v673_v40  ;;  %v705_v40 = vld [vmem:[%s2254_s23 + $0x11a8] sm:$0xff] }
 0x223   : > { %1818 = vst [vmem:[%s2267_s16 + $0xfb0] sm:$0xff] %v1230_v47  ;;  %v1262_v47 = vmul.f32 1.5, %v674_v42  ;;  %v706_v42 = vld [vmem:[%s2254_s23 + $0x11b0] sm:$0xff] }
 0x224   : > { %1819 = vst [vmem:[%s2267_s16 + $0xfb8] sm:$0xff] %v1231_v49  ;;  %v1263_v49 = vmul.f32 1.5, %v675_v44  ;;  %v707_v44 = vld [vmem:[%s2254_s23 + $0x11b8] sm:$0xff] }
 0x225   : > { %1820 = vst [vmem:[%s2267_s16 + $0xfc0] sm:$0xff] %v1232_v51  ;;  %v1264_v51 = vmul.f32 1.5, %v676_v46  ;;  %v708_v46 = vld [vmem:[%s2254_s23 + $0x11c0] sm:$0xff] }
 0x226   : > { %1821 = vst [vmem:[%s2267_s16 + $0xfc8] sm:$0xff] %v1233_v53  ;;  %v1265_v53 = vmul.f32 1.5, %v677_v48  ;;  %v709_v48 = vld [vmem:[%s2254_s23 + $0x11c8] sm:$0xff] }
 0x227   : > { %1822 = vst [vmem:[%s2267_s16 + $0xfd0] sm:$0xff] %v1234_v55  ;;  %v1266_v55 = vmul.f32 1.5, %v678_v50  ;;  %v710_v50 = vld [vmem:[%s2254_s23 + $0x11d0] sm:$0xff] }
 0x228   : > { %1823 = vst [vmem:[%s2267_s16 + $0xfd8] sm:$0xff] %v1235_v57  ;;  %v1267_v57 = vmul.f32 1.5, %v679_v52  ;;  %v711_v52 = vld [vmem:[%s2254_s23 + $0x11d8] sm:$0xff] }
 0x229   : > { %1824 = vst [vmem:[%s2267_s16 + $0xfe0] sm:$0xff] %v1236_v59  ;;  %v1268_v59 = vmul.f32 1.5, %v680_v54  ;;  %v712_v54 = vld [vmem:[%s2254_s23 + $0x11e0] sm:$0xff] }
 0x22a   : > { %1825 = vst [vmem:[%s2267_s16 + $0xfe8] sm:$0xff] %v1237_v61  ;;  %v1269_v61 = vmul.f32 1.5, %v681_v56  ;;  %v713_v56 = vld [vmem:[%s2254_s23 + $0x11e8] sm:$0xff] }
 0x22b   : > { %1826 = vst [vmem:[%s2267_s16 + $0xff0] sm:$0xff] %v1238_v63  ;;  %v1270_v63 = vmul.f32 1.5, %v682_v58  ;;  %v714_v58 = vld [vmem:[%s2254_s23 + $0x11f0] sm:$0xff] }
 0x22c   : > { %1827 = vst [vmem:[%s2267_s16 + $0xff8] sm:$0xff] %v1239_v1  ;;  %v1271_v1 = vmul.f32 1.5, %v683_v60  ;;  %v715_v60 = vld [vmem:[%s2254_s23 + $0x11f8] sm:$0xff] }
 0x22d   : > { %1828 = vst [vmem:[%s2267_s16 + $0x1000] sm:$0xff] %v1240_v3  ;;  %v1272_v3 = vmul.f32 1.5, %v684_v62  ;;  %v716_v62 = vld [vmem:[%s2254_s23 + $0x1200] sm:$0xff] }
 0x22e   : > { %1829 = vst [vmem:[%s2267_s16 + $0x1008] sm:$0xff] %v1241_v5  ;;  %v1273_v5 = vmul.f32 1.5, %v685_v0  ;;  %v717_v0 = vld [vmem:[%s2254_s23 + $0x1208] sm:$0xff] }
 0x22f   : > { %1830 = vst [vmem:[%s2267_s16 + $0x1010] sm:$0xff] %v1242_v7  ;;  %v1274_v7 = vmul.f32 1.5, %v686_v2  ;;  %v718_v2 = vld [vmem:[%s2254_s23 + $0x1210] sm:$0xff] }
 0x230   : > { %1831 = vst [vmem:[%s2267_s16 + $0x1018] sm:$0xff] %v1243_v9  ;;  %v1275_v9 = vmul.f32 1.5, %v687_v4  ;;  %v719_v4 = vld [vmem:[%s2254_s23 + $0x1218] sm:$0xff] }
 0x231   : > { %1832 = vst [vmem:[%s2267_s16 + $0x1020] sm:$0xff] %v1244_v11  ;;  %v1276_v11 = vmul.f32 1.5, %v688_v6  ;;  %v720_v6 = vld [vmem:[%s2254_s23 + $0x1220] sm:$0xff] }
 0x232   : > { %1833 = vst [vmem:[%s2267_s16 + $0x1028] sm:$0xff] %v1245_v13  ;;  %v1277_v13 = vmul.f32 1.5, %v689_v8  ;;  %v721_v8 = vld [vmem:[%s2254_s23 + $0x1228] sm:$0xff] }
 0x233   : > { %1834 = vst [vmem:[%s2267_s16 + $0x1030] sm:$0xff] %v1246_v15  ;;  %v1278_v15 = vmul.f32 1.5, %v690_v10  ;;  %v722_v10 = vld [vmem:[%s2254_s23 + $0x1230] sm:$0xff] }
 0x234   : > { %1835 = vst [vmem:[%s2267_s16 + $0x1038] sm:$0xff] %v1247_v17  ;;  %v1279_v17 = vmul.f32 1.5, %v691_v12  ;;  %v723_v12 = vld [vmem:[%s2254_s23 + $0x1238] sm:$0xff] }
 0x235   : > { %1836 = vst [vmem:[%s2267_s16 + $0x1040] sm:$0xff] %v1248_v19  ;;  %v1280_v19 = vmul.f32 1.5, %v692_v14  ;;  %v724_v14 = vld [vmem:[%s2254_s23 + $0x1240] sm:$0xff] }
 0x236   : > { %1837 = vst [vmem:[%s2267_s16 + $0x1048] sm:$0xff] %v1249_v21  ;;  %v1281_v21 = vmul.f32 1.5, %v693_v16  ;;  %v725_v16 = vld [vmem:[%s2254_s23 + $0x1248] sm:$0xff] }
 0x237   : > { %1838 = vst [vmem:[%s2267_s16 + $0x1050] sm:$0xff] %v1250_v23  ;;  %v1282_v23 = vmul.f32 1.5, %v694_v18  ;;  %v726_v18 = vld [vmem:[%s2254_s23 + $0x1250] sm:$0xff] }
 0x238   : > { %1839 = vst [vmem:[%s2267_s16 + $0x1058] sm:$0xff] %v1251_v25  ;;  %v1283_v25 = vmul.f32 1.5, %v695_v20  ;;  %v727_v20 = vld [vmem:[%s2254_s23 + $0x1258] sm:$0xff] }
 0x239   : > { %1840 = vst [vmem:[%s2267_s16 + $0x1060] sm:$0xff] %v1252_v27  ;;  %v1284_v27 = vmul.f32 1.5, %v696_v22  ;;  %v1314_v22 = vmul.f32 1.5, %v726_v18 }
 0x23a   : > { %1841 = vst [vmem:[%s2267_s16 + $0x1068] sm:$0xff] %v1253_v29  ;;  %v1285_v29 = vmul.f32 1.5, %v697_v24 }
 0x23b   : > { %1842 = vst [vmem:[%s2267_s16 + $0x1070] sm:$0xff] %v1254_v31  ;;  %v1286_v31 = vmul.f32 1.5, %v698_v26 }
 0x23c   : > { %1843 = vst [vmem:[%s2267_s16 + $0x1078] sm:$0xff] %v1255_v33  ;;  %v1287_v33 = vmul.f32 1.5, %v699_v28 }
 0x23d   : > { %1844 = vst [vmem:[%s2267_s16 + $0x1080] sm:$0xff] %v1256_v35  ;;  %v1288_v35 = vmul.f32 1.5, %v700_v30 }
 0x23e   : > { %1845 = vst [vmem:[%s2267_s16 + $0x1088] sm:$0xff] %v1257_v37  ;;  %v1289_v37 = vmul.f32 1.5, %v701_v32 }
 0x23f   : > { %1846 = vst [vmem:[%s2267_s16 + $0x1090] sm:$0xff] %v1258_v39  ;;  %v1290_v39 = vmul.f32 1.5, %v702_v34 }
 0x240   : > { %1847 = vst [vmem:[%s2267_s16 + $0x1098] sm:$0xff] %v1259_v41  ;;  %v1291_v41 = vmul.f32 1.5, %v703_v36 }
 0x241   : > { %1848 = vst [vmem:[%s2267_s16 + $0x10a0] sm:$0xff] %v1260_v43  ;;  %v1292_v43 = vmul.f32 1.5, %v704_v38 }
 0x242   : > { %1849 = vst [vmem:[%s2267_s16 + $0x10a8] sm:$0xff] %v1261_v45  ;;  %v1293_v45 = vmul.f32 1.5, %v705_v40 }
 0x243   : > { %1850 = vst [vmem:[%s2267_s16 + $0x10b0] sm:$0xff] %v1262_v47  ;;  %v1294_v47 = vmul.f32 1.5, %v706_v42 }
 0x244   : > { %1851 = vst [vmem:[%s2267_s16 + $0x10b8] sm:$0xff] %v1263_v49  ;;  %v1295_v49 = vmul.f32 1.5, %v707_v44 }
 0x245   : > { %1852 = vst [vmem:[%s2267_s16 + $0x10c0] sm:$0xff] %v1264_v51  ;;  %v1296_v51 = vmul.f32 1.5, %v708_v46 }
 0x246   : > { %1853 = vst [vmem:[%s2267_s16 + $0x10c8] sm:$0xff] %v1265_v53  ;;  %v1297_v53 = vmul.f32 1.5, %v709_v48 }
 0x247   : > { %1854 = vst [vmem:[%s2267_s16 + $0x10d0] sm:$0xff] %v1266_v55  ;;  %v1298_v55 = vmul.f32 1.5, %v710_v50 }
 0x248   : > { %1855 = vst [vmem:[%s2267_s16 + $0x10d8] sm:$0xff] %v1267_v57  ;;  %v1299_v57 = vmul.f32 1.5, %v711_v52 }
 0x249   : > { %1856 = vst [vmem:[%s2267_s16 + $0x10e0] sm:$0xff] %v1268_v59  ;;  %v1300_v59 = vmul.f32 1.5, %v712_v54 }
 0x24a   : > { %1857 = vst [vmem:[%s2267_s16 + $0x10e8] sm:$0xff] %v1269_v61  ;;  %v1301_v61 = vmul.f32 1.5, %v713_v56 }
 0x24b   : > { %1858 = vst [vmem:[%s2267_s16 + $0x10f0] sm:$0xff] %v1270_v63  ;;  %v1302_v63 = vmul.f32 1.5, %v714_v58 }
 0x24c   : > { %1859 = vst [vmem:[%s2267_s16 + $0x10f8] sm:$0xff] %v1271_v1  ;;  %v1303_v1 = vmul.f32 1.5, %v715_v60 }
 0x24d   : > { %1860 = vst [vmem:[%s2267_s16 + $0x1100] sm:$0xff] %v1272_v3  ;;  %v1304_v3 = vmul.f32 1.5, %v716_v62 }
 0x24e   : > { %1861 = vst [vmem:[%s2267_s16 + $0x1108] sm:$0xff] %v1273_v5  ;;  %v1305_v5 = vmul.f32 1.5, %v717_v0 }
 0x24f   : > { %1862 = vst [vmem:[%s2267_s16 + $0x1110] sm:$0xff] %v1274_v7  ;;  %v1306_v7 = vmul.f32 1.5, %v718_v2 }
 0x250   : > { %1863 = vst [vmem:[%s2267_s16 + $0x1118] sm:$0xff] %v1275_v9  ;;  %v1307_v9 = vmul.f32 1.5, %v719_v4 }
 0x251   : > { %1864 = vst [vmem:[%s2267_s16 + $0x1120] sm:$0xff] %v1276_v11  ;;  %v1308_v11 = vmul.f32 1.5, %v720_v6 }
 0x252   : > { %1865 = vst [vmem:[%s2267_s16 + $0x1128] sm:$0xff] %v1277_v13  ;;  %v1309_v13 = vmul.f32 1.5, %v721_v8 }
 0x253   : > { %1866 = vst [vmem:[%s2267_s16 + $0x1130] sm:$0xff] %v1278_v15  ;;  %v1310_v15 = vmul.f32 1.5, %v722_v10 }
 0x254   : > { %1867 = vst [vmem:[%s2267_s16 + $0x1138] sm:$0xff] %v1279_v17  ;;  %v1311_v17 = vmul.f32 1.5, %v723_v12 }
 0x255   : > { %1868 = vst [vmem:[%s2267_s16 + $0x1140] sm:$0xff] %v1280_v19  ;;  %v1312_v19 = vmul.f32 1.5, %v724_v14 }
 0x256   : > { %1869 = vst [vmem:[%s2267_s16 + $0x1148] sm:$0xff] %v1281_v21  ;;  %v1313_v21 = vmul.f32 1.5, %v725_v16 }
 0x257   : > { %1870 = vst [vmem:[%s2267_s16 + $0x1150] sm:$0xff] %v1282_v23  ;;  %v1315_v23 = vmul.f32 1.5, %v727_v20 }
 0x258   : > { %1871 = vst [vmem:[%s2267_s16 + $0x1158] sm:$0xff] %v1283_v25 }
 0x259   : > { %1872 = vst [vmem:[%s2267_s16 + $0x1160] sm:$0xff] %v1284_v27 }
 0x25a   : > { %1873 = vst [vmem:[%s2267_s16 + $0x1168] sm:$0xff] %v1285_v29 }
 0x25b   : > { %1874 = vst [vmem:[%s2267_s16 + $0x1170] sm:$0xff] %v1286_v31 }
 0x25c   : > { %1875 = vst [vmem:[%s2267_s16 + $0x1178] sm:$0xff] %v1287_v33 }
 0x25d   : > { %1876 = vst [vmem:[%s2267_s16 + $0x1180] sm:$0xff] %v1288_v35 }
 0x25e   : > { %1877 = vst [vmem:[%s2267_s16 + $0x1188] sm:$0xff] %v1289_v37 }
 0x25f   : > { %1878 = vst [vmem:[%s2267_s16 + $0x1190] sm:$0xff] %v1290_v39 }
 0x260   : > { %1879 = vst [vmem:[%s2267_s16 + $0x1198] sm:$0xff] %v1291_v41 }
 0x261   : > { %1880 = vst [vmem:[%s2267_s16 + $0x11a0] sm:$0xff] %v1292_v43 }
 0x262   : > { %1881 = vst [vmem:[%s2267_s16 + $0x11a8] sm:$0xff] %v1293_v45 }
 0x263   : > { %1882 = vst [vmem:[%s2267_s16 + $0x11b0] sm:$0xff] %v1294_v47 }
 0x264   : > { %1883 = vst [vmem:[%s2267_s16 + $0x11b8] sm:$0xff] %v1295_v49 }
 0x265   : > { %1884 = vst [vmem:[%s2267_s16 + $0x11c0] sm:$0xff] %v1296_v51 }
 0x266   : > { %1885 = vst [vmem:[%s2267_s16 + $0x11c8] sm:$0xff] %v1297_v53 }
 0x267   : > { %1886 = vst [vmem:[%s2267_s16 + $0x11d0] sm:$0xff] %v1298_v55 }
 0x268   : > { %1887 = vst [vmem:[%s2267_s16 + $0x11d8] sm:$0xff] %v1299_v57 }
 0x269   : > { %1888 = vst [vmem:[%s2267_s16 + $0x11e0] sm:$0xff] %v1300_v59 }
 0x26a   : > { %1889 = vst [vmem:[%s2267_s16 + $0x11e8] sm:$0xff] %v1301_v61 }
 0x26b   : > { %1890 = vst [vmem:[%s2267_s16 + $0x11f0] sm:$0xff] %v1302_v63 }
 0x26c   : > { %1891 = vst [vmem:[%s2267_s16 + $0x11f8] sm:$0xff] %v1303_v1 }
 0x26d   : > { %1892 = vst [vmem:[%s2267_s16 + $0x1200] sm:$0xff] %v1304_v3 }
 0x26e   : > { %1893 = vst [vmem:[%s2267_s16 + $0x1208] sm:$0xff] %v1305_v5 }
 0x26f   : > { %1894 = vst [vmem:[%s2267_s16 + $0x1210] sm:$0xff] %v1306_v7 }
 0x270   : > { %1895 = vst [vmem:[%s2267_s16 + $0x1218] sm:$0xff] %v1307_v9 }
 0x271   : > { %1896 = vst [vmem:[%s2267_s16 + $0x1220] sm:$0xff] %v1308_v11 }
 0x272   : > { %1897 = vst [vmem:[%s2267_s16 + $0x1228] sm:$0xff] %v1309_v13 }
 0x273   : > { %1898 = vst [vmem:[%s2267_s16 + $0x1230] sm:$0xff] %v1310_v15 }
 0x274   : > { %1899 = vst [vmem:[%s2267_s16 + $0x1238] sm:$0xff] %v1311_v17 }
 0x275   : > { %1900 = vst [vmem:[%s2267_s16 + $0x1240] sm:$0xff] %v1312_v19 }
 0x276   : > { %1901 = vst [vmem:[%s2267_s16 + $0x1248] sm:$0xff] %v1313_v21 }
 0x277   : > { %1902 = vst [vmem:[%s2267_s16 + $0x1250] sm:$0xff] %v1314_v22 }
 0x278   : > { %1903 = vst [vmem:[%s2267_s16 + $0x1258] sm:$0xff] %v1315_v23 }
 0x279   : > { %2119 = shalt.err (!%p2116_p7)
}
 0x27a   : > { %s2162_s14 = smov 512   ;;  %s2163_s19 = smov 32  }
 0x27b   : > { %2014 = dma.vmem_to_hbm [thread:$0]  (%p2220_p11), %s1919_s27, 75264, %s1921_s28, %s1905_s29, %s2162_s14, %s2162_s14, %s2163_s19  }
 0x27c PF: > { %s1935_s20 = sand.u32 1, %s2146_s6   ;;  %p2021_p8 = pnand %p1996_p9, %p2224_p12 }
 0x27d   : > { %s1936_s21 = scalar_lea.sflag [#allocation4], %s1935_s20 }
 0x27e   : > { %p2022_p10 = pneg %p2021_p8 }
 0x280   : > { %2141 = dma.done.wait (%p2022_p10), %s1936_s21, 75264  }
 0x281   : > { %2143 = vsyncadd (%p2022_p10), %s1936_s21, 4294892032  ;;  %p14_p0 = scmp.ge.s32.totalorder %s2199_s12, 4   ;;  %s3478_s6 = smov %s2150_s7 }
 0x282   : > { %s3479_s7 = smov %s2154_s8  ;;  %s3480_s8 = smov %s2211_s15 }
 0x283   : > { %s3481_s9 = smov %s2199_s12  ;;  %16 = sbr.rel (!%p14_p0) target bundleno = 5 (0x5), region = 69 }
 0x288   :  { %1942 = vsyncpa [#allocation3], 1 }
 0x289   :  { %1944 = vsyncpa [#allocation3 + $0x1], 1 }
 0x28a   :  { %1945 = vsyncpa [#allocation4], 1 }
 0x28b   :  { %1947 = vsyncpa [#allocation4 + $0x1], 1 }

</bundles_post_ra>
